<compile_context>
chip_gen: v7x
topology: tpu7x:2x2x1
jax: 0.10.0
libtpu: 0.0.40
codegen_flags: <defaults>
</compile_context>

<pallas_src>
import math

import jax
import jax.numpy as jnp
from jax.experimental import pallas as pl
from jax.experimental.pallas import tpu as pltpu

Z_MIN = 0.001
Z_MAX = 0.1
DELTA_T = 1.0


def _stp_seq_kernel(x2d_ref, h0_ref, u0_ref, x0_ref,
                    ucap_ref, c1_ref, omzu_ref, zx_ref, omzx_ref,
                    px_ref, at_ref, wt_ref, bias2_ref,
                    hseq_ref, u_out_ref, x_out_ref,
                    xz_a_ref, xz_b_ref):
    T, B, H = hseq_ref.shape
    sig = jax.nn.sigmoid

    # ---- state-independent input projections, ONE fused GEMM for all T steps ----
    #      columns [:H]  -> scalar_beta*|p| @ x + b_z   (gate path, bias folded in)
    #      columns [H:]  -> p @ x + b                   (candidate path, bias folded in)
    xz = jnp.dot(x2d_ref[...], px_ref[...],
                 preferred_element_type=jnp.float32) + bias2_ref[...]   # (T*B, 2H)
    xz_a_ref[...] = xz[:, :H].reshape(T, B, H)
    xz_b_ref[...] = xz[:, H:].reshape(T, B, H)

    # ---- hoisted parameter-only quantities, broadcast ONCE to (B, H) ----
    ucap = jnp.broadcast_to(ucap_ref[...], (B, H))     # 0.99*sigmoid(c_U)
    c1 = jnp.broadcast_to(c1_ref[...], (B, H))         # ucap * z_u
    omz_u = jnp.broadcast_to(omzu_ref[...], (B, H))    # 1 - z_u
    z_x = jnp.broadcast_to(zx_ref[...], (B, H))
    omz_x = jnp.broadcast_to(omzx_ref[...], (B, H))    # 1 - z_x
    at = at_ref[...]                                   # (H, H) = (scalar_alpha*|w|)^T
    wt = wt_ref[...]                                   # (H, H) = w^T

    # ---- initial state broadcast once (module broadcasts via clamp/matmul) ----
    h = jnp.broadcast_to(h0_ref[...], (B, H))
    U = jnp.broadcast_to(u0_ref[...], (B, H))
    X = jnp.broadcast_to(x0_ref[...], (B, H))

    # Short static trip count: trace-time unroll with static Ref indices.
    for t in range(T):
        # --- facilitation variable U (uses old U, old h) ---
        U_new = c1 + omz_u * U + DELTA_T * ucap * (1.0 - U) * h
        U_new = jnp.minimum(jnp.maximum(U_new, ucap), 1.0)     # clamp(Ucap, 1)
        # --- depression variable X (uses new U, old X, old h) ---
        X_new = z_x + omz_x * X - DELTA_T * U_new * X * h
        # --- gate + candidate (batch on sublanes, hidden on lanes) ---
        gz = jnp.dot(h, at, preferred_element_type=jnp.float32)               # (B, H)
        gc = jnp.dot(U_new * X_new * h, wt, preferred_element_type=jnp.float32)
        z_h = sig(gz + xz_a_ref[t])            # b_z already folded into xz_a
        cand = sig(gc + xz_b_ref[t])           # b   already folded into xz_b
        h_new = h + z_h * (cand - h)           # == (1 - z_h)*h + z_h*cand
        hseq_ref[t] = h_new
        h, U, X = h_new, U_new, X_new

    u_out_ref[...] = U
    x_out_ref[...] = X


def _prepare_inputs(x_seq, h_t, U, X, params):
    """Hoisted parameter-only math + layout glue, once per sequence."""
    sig = jax.nn.sigmoid
    T, I, B = x_seq.shape
    H = params["w"].shape[0]

    z_u = (Z_MIN + (Z_MAX - Z_MIN) * sig(params["c_u"])).reshape(1, H)
    z_x = (Z_MIN + (Z_MAX - Z_MIN) * sig(params["c_x"])).reshape(1, H)
    ucap = (0.99 * sig(params["c_U"])).reshape(1, H)
    c1 = ucap * z_u                                           # (1, H)
    omz_u = 1.0 - z_u                                         # (1, H)
    omz_x = 1.0 - z_x                                         # (1, H)

    A = params["scalar_alpha"][0] * jnp.abs(params["w"])      # sa * |w|  (H, H)
    P = params["scalar_beta"][0] * jnp.abs(params["p"])       # sb * |p|  (H, I)
    px = jnp.concatenate([P.T, params["p"].T], axis=1)        # (I, 2H) fused x-side weights
    at = A.T                                                  # (H, H)
    wt = params["w"].T                                        # (H, H)
    bias2 = jnp.concatenate([params["b_z"].reshape(1, H),
                             params["b"].reshape(1, H)], axis=1)   # (1, 2H)

    # one transpose/reshape for the whole sequence (not per step)
    x2d = jnp.transpose(x_seq, (0, 2, 1)).reshape(T * B, I).astype(jnp.float32)
    h0 = h_t.reshape(1, H).astype(jnp.float32)
    u0 = U.reshape(1, H).astype(jnp.float32)
    x0 = X.reshape(1, H).astype(jnp.float32)
    return (x2d, h0, u0, x0, ucap, c1, omz_u, z_x, omz_x, px, at, wt, bias2)


@jax.jit
def stp_forward_seq(x_seq, h_t, U, X, params):
    """Run T recurrent steps in one fused Pallas call.

    x_seq: (T, I, B); h_t: (1, H); U, X: (H, 1).
    Returns h_seq (T, B, H), U_final (B, H), X_final (B, H).
    """
    T, I, B = x_seq.shape
    H = params["w"].shape[0]
    inputs = _prepare_inputs(x_seq, h_t, U, X, params)
    vm = pl.BlockSpec(memory_space=pltpu.MemorySpace.VMEM)

    # TODO(synk): the 'rich' complexity branch (3-D U/X state + einsum) is not
    # implemented; only the 'poor' branch of the module is translated.
    h_seq, U_f, X_f = pl.pallas_call(
        _stp_seq_kernel,
        out_shape=(
            jax.ShapeDtypeStruct((T, B, H), jnp.float32),
            jax.ShapeDtypeStruct((B, H), jnp.float32),
            jax.ShapeDtypeStruct((B, H), jnp.float32),
        ),
        in_specs=[vm] * len(inputs),
        out_specs=(vm, vm, vm),
        scratch_shapes=[
            pltpu.VMEM((T, B, H), jnp.float32),   # gate-path input projection (+b_z)
            pltpu.VMEM((T, B, H), jnp.float32),   # candidate-path input projection (+b)
        ],
        compiler_params=pltpu.CompilerParams(vmem_limit_bytes=32 * 1024 * 1024),
    )(*inputs)
    return h_seq, U_f, X_f


def stp_reference_seq(x_seq, h_t, U, X, params):
    """Pure-JAX replica of the PyTorch 'poor' forward, looped over time."""
    sig = jax.nn.sigmoid
    T, I, B = x_seq.shape
    H = params["w"].shape[0]
    h = h_t.T                                                 # (H, 1)
    hs = []
    for t in range(T):
        x = x_seq[t]                                          # (I, B)
        z_u = Z_MIN + (Z_MAX - Z_MIN) * sig(params["c_u"])
        Ucap = 0.99 * sig(params["c_U"])
        U = Ucap * z_u + (1.0 - z_u) * U + DELTA_T * Ucap * (1.0 - U) * h
        Ucap_b = jnp.broadcast_to(Ucap, (H, B))
        U = jnp.clip(jnp.broadcast_to(U, (H, B)), Ucap_b, 1.0)
        z_x = Z_MIN + (Z_MAX - Z_MIN) * sig(params["c_x"])
        X = z_x + (1.0 - z_x) * X - DELTA_T * U * X * h
        aw = jnp.abs(params["w"])
        ap = jnp.abs(params["p"])
        z_h = sig(params["scalar_alpha"][0] * (aw @ h)
                  + params["scalar_beta"][0] * (ap @ x) + params["b_z"])
        h = (1.0 - z_h) * h + z_h * sig(params["w"] @ (U * X * h)
                                        + params["p"] @ x + params["b"])
        hs.append(h.T)                                        # (B, H)
    return jnp.stack(hs, axis=0), U, X


def init_params(key, input_size, hidden_size):
    """Deterministic init mirroring the module's __init__ (complexity='poor')."""
    H, I = hidden_size, input_size
    kh = 1.0 / math.sqrt(H)
    ki = 1.0 / math.sqrt(I)
    keys = jax.random.split(key, 6)
    return {
        "c_x": jnp.zeros((H, 1), jnp.float32),
        "c_u": jnp.zeros((H, 1), jnp.float32),
        "c_U": jnp.full((H, 1), 2.0, jnp.float32),
        "w": jax.random.uniform(keys[0], (H, H), jnp.float32, -kh, kh),
        "p": jax.random.uniform(keys[1], (H, I), jnp.float32, -ki, ki),
        "b": jax.random.uniform(keys[2], (H, 1), jnp.float32, -1.0, 1.0),
        "scalar_alpha": jax.random.uniform(keys[3], (1,), jnp.float32, -kh, kh),
        "scalar_beta": jax.random.uniform(keys[4], (1,), jnp.float32, -kh, kh),
        "b_z": jax.random.uniform(keys[5], (H, 1), jnp.float32, -kh, kh),
    }


if __name__ == "__main__":
    INPUT_SIZE = 16
    HIDDEN_SIZE = 32
    BATCH = 8
    SEQ = 8

    root = jax.random.PRNGKey(0)
    k_param, k_x = jax.random.split(root)

    params = init_params(k_param, INPUT_SIZE, HIDDEN_SIZE)

    # Initial module state (as in __init__ for complexity='poor').
    h_t = jnp.zeros((1, HIDDEN_SIZE), jnp.float32)
    U0 = jnp.full((HIDDEN_SIZE, 1), 0.99, jnp.float32)
    X0 = jnp.ones((HIDDEN_SIZE, 1), jnp.float32)

    # Sequence of inputs; each step's x is (input_size, batch) per the module.
    x_seq = jax.random.normal(k_x, (SEQ, INPUT_SIZE, BATCH), jnp.float32)

    h_seq, U_f, X_f = stp_forward_seq(x_seq, h_t, U0, X0, params)
    jax.block_until_ready(h_seq)

    h_ref, U_ref, X_ref = stp_reference_seq(x_seq, h_t, U0, X0, params)
    assert h_seq.shape == (SEQ, BATCH, HIDDEN_SIZE)
    assert jnp.allclose(h_seq, h_ref, atol=5e-4, rtol=5e-4)
    assert jnp.allclose(U_f, U_ref.T, atol=5e-4, rtol=5e-4)
    assert jnp.allclose(X_f, X_ref.T, atol=5e-4, rtol=5e-4)

    print("KERNEL_OK")
</pallas_src>

<mosaic_0001>
module attributes {stable_mosaic.version = 11 : i64} {
  func.func @_stp_seq_kernel(%arg0: memref<64x16xf32, #tpu.memory_space<vmem>>, %arg1: memref<1x32xf32, #tpu.memory_space<vmem>>, %arg2: memref<1x32xf32, #tpu.memory_space<vmem>>, %arg3: memref<1x32xf32, #tpu.memory_space<vmem>>, %arg4: memref<1x32xf32, #tpu.memory_space<vmem>>, %arg5: memref<1x32xf32, #tpu.memory_space<vmem>>, %arg6: memref<1x32xf32, #tpu.memory_space<vmem>>, %arg7: memref<1x32xf32, #tpu.memory_space<vmem>>, %arg8: memref<1x32xf32, #tpu.memory_space<vmem>>, %arg9: memref<16x64xf32, #tpu.memory_space<vmem>>, %arg10: memref<32x32xf32, #tpu.memory_space<vmem>>, %arg11: memref<32x32xf32, #tpu.memory_space<vmem>>, %arg12: memref<1x64xf32, #tpu.memory_space<vmem>>, %arg13: memref<8x8x32xf32, #tpu.memory_space<vmem>>, %arg14: memref<8x32xf32, #tpu.memory_space<vmem>>, %arg15: memref<8x32xf32, #tpu.memory_space<vmem>>, %arg16: memref<8x8x32xf32, #tpu.memory_space<vmem>>, %arg17: memref<8x8x32xf32, #tpu.memory_space<vmem>>) attributes {dimension_semantics = [], scalar_prefetch = 0 : i64, scratch_operands = 2 : i64, tpu.core_type = #tpu.core_type<tc>} {
    %c0 = arith.constant 0 : index
    %c0_0 = arith.constant 0 : index
    %0 = vector.load %arg0[%c0, %c0_0] : memref<64x16xf32, #tpu.memory_space<vmem>>, vector<64x16xf32>
    %c0_1 = arith.constant 0 : index
    %c0_2 = arith.constant 0 : index
    %1 = vector.load %arg9[%c0_1, %c0_2] : memref<16x64xf32, #tpu.memory_space<vmem>>, vector<16x64xf32>
    %cst = arith.constant dense<0.000000e+00> : vector<64x64xf32>
    %2 = tpu.matmul %0, %1, %cst {dimension_numbers = #tpu.dot_dimension_numbers<[1], [0], [0], [1], [0, 0, 1, 1], [], []>} : vector<64x16xf32>, vector<16x64xf32>, vector<64x64xf32> -> vector<64x64xf32>
    %c0_3 = arith.constant 0 : index
    %c0_4 = arith.constant 0 : index
    %3 = vector.load %arg12[%c0_3, %c0_4] : memref<1x64xf32, #tpu.memory_space<vmem>>, vector<1x64xf32>
    %4 = vector.broadcast %3 : vector<1x64xf32> to vector<64x64xf32>
    %5 = arith.addf %2, %4 : vector<64x64xf32>
    %6 = vector.extract_strided_slice %5 {offsets = [0, 0], sizes = [64, 32], strides = [1, 1]} : vector<64x64xf32> to vector<64x32xf32>
    %7 = vector.shape_cast %6 : vector<64x32xf32> to vector<8x8x32xf32>
    %c0_5 = arith.constant 0 : index
    %c0_6 = arith.constant 0 : index
    %c0_7 = arith.constant 0 : index
    %8 = vector.load %arg16[%c0_5, %c0_6, %c0_7] : memref<8x8x32xf32, #tpu.memory_space<vmem>>, vector<8x8x32xf32>
    tpu.vector_store %arg16[%c0_5, %c0_6, %c0_7], %7 {strides = array<i32>} : memref<8x8x32xf32, #tpu.memory_space<vmem>>, vector<8x8x32xf32>,
    %9 = vector.extract_strided_slice %5 {offsets = [0, 32], sizes = [64, 32], strides = [1, 1]} : vector<64x64xf32> to vector<64x32xf32>
    %10 = vector.shape_cast %9 : vector<64x32xf32> to vector<8x8x32xf32>
    %c0_8 = arith.constant 0 : index
    %c0_9 = arith.constant 0 : index
    %c0_10 = arith.constant 0 : index
    %11 = vector.load %arg17[%c0_8, %c0_9, %c0_10] : memref<8x8x32xf32, #tpu.memory_space<vmem>>, vector<8x8x32xf32>
    tpu.vector_store %arg17[%c0_8, %c0_9, %c0_10], %10 {strides = array<i32>} : memref<8x8x32xf32, #tpu.memory_space<vmem>>, vector<8x8x32xf32>,
    %c0_11 = arith.constant 0 : index
    %c0_12 = arith.constant 0 : index
    %12 = vector.load %arg4[%c0_11, %c0_12] : memref<1x32xf32, #tpu.memory_space<vmem>>, vector<1x32xf32>
    %13 = vector.shape_cast %12 : vector<1x32xf32> to vector<1x32xf32>
    %14 = vector.broadcast %13 : vector<1x32xf32> to vector<8x32xf32>
    %c0_13 = arith.constant 0 : index
    %c0_14 = arith.constant 0 : index
    %15 = vector.load %arg5[%c0_13, %c0_14] : memref<1x32xf32, #tpu.memory_space<vmem>>, vector<1x32xf32>
    %16 = vector.shape_cast %15 : vector<1x32xf32> to vector<1x32xf32>
    %17 = vector.broadcast %16 : vector<1x32xf32> to vector<8x32xf32>
    %c0_15 = arith.constant 0 : index
    %c0_16 = arith.constant 0 : index
    %18 = vector.load %arg6[%c0_15, %c0_16] : memref<1x32xf32, #tpu.memory_space<vmem>>, vector<1x32xf32>
    %19 = vector.shape_cast %18 : vector<1x32xf32> to vector<1x32xf32>
    %20 = vector.broadcast %19 : vector<1x32xf32> to vector<8x32xf32>
    %c0_17 = arith.constant 0 : index
    %c0_18 = arith.constant 0 : index
    %21 = vector.load %arg7[%c0_17, %c0_18] : memref<1x32xf32, #tpu.memory_space<vmem>>, vector<1x32xf32>
    %22 = vector.shape_cast %21 : vector<1x32xf32> to vector<1x32xf32>
    %23 = vector.broadcast %22 : vector<1x32xf32> to vector<8x32xf32>
    %c0_19 = arith.constant 0 : index
    %c0_20 = arith.constant 0 : index
    %24 = vector.load %arg8[%c0_19, %c0_20] : memref<1x32xf32, #tpu.memory_space<vmem>>, vector<1x32xf32>
    %25 = vector.shape_cast %24 : vector<1x32xf32> to vector<1x32xf32>
    %26 = vector.broadcast %25 : vector<1x32xf32> to vector<8x32xf32>
    %c0_21 = arith.constant 0 : index
    %c0_22 = arith.constant 0 : index
    %27 = vector.load %arg10[%c0_21, %c0_22] : memref<32x32xf32, #tpu.memory_space<vmem>>, vector<32x32xf32>
    %c0_23 = arith.constant 0 : index
    %c0_24 = arith.constant 0 : index
    %28 = vector.load %arg11[%c0_23, %c0_24] : memref<32x32xf32, #tpu.memory_space<vmem>>, vector<32x32xf32>
    %c0_25 = arith.constant 0 : index
    %c0_26 = arith.constant 0 : index
    %29 = vector.load %arg1[%c0_25, %c0_26] : memref<1x32xf32, #tpu.memory_space<vmem>>, vector<1x32xf32>
    %30 = vector.shape_cast %29 : vector<1x32xf32> to vector<1x32xf32>
    %31 = vector.broadcast %30 : vector<1x32xf32> to vector<8x32xf32>
    %c0_27 = arith.constant 0 : index
    %c0_28 = arith.constant 0 : index
    %32 = vector.load %arg2[%c0_27, %c0_28] : memref<1x32xf32, #tpu.memory_space<vmem>>, vector<1x32xf32>
    %33 = vector.shape_cast %32 : vector<1x32xf32> to vector<1x32xf32>
    %34 = vector.broadcast %33 : vector<1x32xf32> to vector<8x32xf32>
    %c0_29 = arith.constant 0 : index
    %c0_30 = arith.constant 0 : index
    %35 = vector.load %arg3[%c0_29, %c0_30] : memref<1x32xf32, #tpu.memory_space<vmem>>, vector<1x32xf32>
    %36 = vector.shape_cast %35 : vector<1x32xf32> to vector<1x32xf32>
    %37 = vector.broadcast %36 : vector<1x32xf32> to vector<8x32xf32>
    %38 = arith.mulf %20, %34 : vector<8x32xf32>
    %39 = arith.addf %17, %38 : vector<8x32xf32>
    %cst_31 = arith.constant 1.000000e+00 : f32
    %40 = vector.broadcast %cst_31 : f32 to vector<8x32xf32>
    %41 = arith.mulf %40, %14 : vector<8x32xf32>
    %cst_32 = arith.constant 1.000000e+00 : f32
    %42 = vector.broadcast %cst_32 : f32 to vector<8x32xf32>
    %43 = arith.subf %42, %34 : vector<8x32xf32>
    %44 = arith.mulf %41, %43 : vector<8x32xf32>
    %45 = arith.mulf %44, %31 : vector<8x32xf32>
    %46 = arith.addf %39, %45 : vector<8x32xf32>
    %47 = arith.maximumf %46, %14 : vector<8x32xf32>
    %cst_33 = arith.constant 1.000000e+00 : f32
    %48 = vector.broadcast %cst_33 : f32 to vector<8x32xf32>
    %49 = arith.minimumf %47, %48 : vector<8x32xf32>
    %50 = arith.mulf %26, %37 : vector<8x32xf32>
    %51 = arith.addf %23, %50 : vector<8x32xf32>
    %cst_34 = arith.constant 1.000000e+00 : f32
    %52 = vector.broadcast %cst_34 : f32 to vector<8x32xf32>
    %53 = arith.mulf %52, %49 : vector<8x32xf32>
    %54 = arith.mulf %53, %37 : vector<8x32xf32>
    %55 = arith.mulf %54, %31 : vector<8x32xf32>
    %56 = arith.subf %51, %55 : vector<8x32xf32>
    %cst_35 = arith.constant dense<0.000000e+00> : vector<8x32xf32>
    %57 = tpu.matmul %31, %27, %cst_35 {dimension_numbers = #tpu.dot_dimension_numbers<[1], [0], [0], [1], [0, 0, 1, 1], [], []>} : vector<8x32xf32>, vector<32x32xf32>, vector<8x32xf32> -> vector<8x32xf32>
    %58 = arith.mulf %49, %56 : vector<8x32xf32>
    %59 = arith.mulf %58, %31 : vector<8x32xf32>
    %cst_36 = arith.constant dense<0.000000e+00> : vector<8x32xf32>
    %60 = tpu.matmul %59, %28, %cst_36 {dimension_numbers = #tpu.dot_dimension_numbers<[1], [0], [0], [1], [0, 0, 1, 1], [], []>} : vector<8x32xf32>, vector<32x32xf32>, vector<8x32xf32> -> vector<8x32xf32>
    %c0_37 = arith.constant 0 : index
    %c0_38 = arith.constant 0 : index
    %c0_39 = arith.constant 0 : index
    %61 = vector.load %arg16[%c0_37, %c0_38, %c0_39] : memref<8x8x32xf32, #tpu.memory_space<vmem>>, vector<1x8x32xf32>
    %62 = vector.shape_cast %61 : vector<1x8x32xf32> to vector<8x32xf32>
    %63 = arith.addf %57, %62 : vector<8x32xf32>
    %64 = arith.negf %63 : vector<8x32xf32>
    %65 = math.exp %64 : vector<8x32xf32>
    %cst_40 = arith.constant 1.000000e+00 : f32
    %66 = vector.broadcast %cst_40 : f32 to vector<8x32xf32>
    %67 = arith.addf %66, %65 : vector<8x32xf32>
    %68 = arith.divf %66, %67 : vector<8x32xf32>
    %c0_41 = arith.constant 0 : index
    %c0_42 = arith.constant 0 : index
    %c0_43 = arith.constant 0 : index
    %69 = vector.load %arg17[%c0_41, %c0_42, %c0_43] : memref<8x8x32xf32, #tpu.memory_space<vmem>>, vector<1x8x32xf32>
    %70 = vector.shape_cast %69 : vector<1x8x32xf32> to vector<8x32xf32>
    %71 = arith.addf %60, %70 : vector<8x32xf32>
    %72 = arith.negf %71 : vector<8x32xf32>
    %73 = math.exp %72 : vector<8x32xf32>
    %cst_44 = arith.constant 1.000000e+00 : f32
    %74 = vector.broadcast %cst_44 : f32 to vector<8x32xf32>
    %75 = arith.addf %74, %73 : vector<8x32xf32>
    %76 = arith.divf %74, %75 : vector<8x32xf32>
    %77 = arith.subf %76, %31 : vector<8x32xf32>
    %78 = arith.mulf %68, %77 : vector<8x32xf32>
    %79 = arith.addf %31, %78 : vector<8x32xf32>
    %c0_45 = arith.constant 0 : index
    %c0_46 = arith.constant 0 : index
    %c0_47 = arith.constant 0 : index
    %80 = vector.load %arg13[%c0_45, %c0_46, %c0_47] : memref<8x8x32xf32, #tpu.memory_space<vmem>>, vector<1x8x32xf32>
    %81 = vector.shape_cast %80 : vector<1x8x32xf32> to vector<8x32xf32>
    %82 = vector.shape_cast %79 : vector<8x32xf32> to vector<1x8x32xf32>
    tpu.vector_store %arg13[%c0_45, %c0_46, %c0_47], %82 {strides = array<i32>} : memref<8x8x32xf32, #tpu.memory_space<vmem>>, vector<1x8x32xf32>,
    %83 = arith.mulf %20, %49 : vector<8x32xf32>
    %84 = arith.addf %17, %83 : vector<8x32xf32>
    %cst_48 = arith.constant 1.000000e+00 : f32
    %85 = vector.broadcast %cst_48 : f32 to vector<8x32xf32>
    %86 = arith.mulf %85, %14 : vector<8x32xf32>
    %cst_49 = arith.constant 1.000000e+00 : f32
    %87 = vector.broadcast %cst_49 : f32 to vector<8x32xf32>
    %88 = arith.subf %87, %49 : vector<8x32xf32>
    %89 = arith.mulf %86, %88 : vector<8x32xf32>
    %90 = arith.mulf %89, %79 : vector<8x32xf32>
    %91 = arith.addf %84, %90 : vector<8x32xf32>
    %92 = arith.maximumf %91, %14 : vector<8x32xf32>
    %cst_50 = arith.constant 1.000000e+00 : f32
    %93 = vector.broadcast %cst_50 : f32 to vector<8x32xf32>
    %94 = arith.minimumf %92, %93 : vector<8x32xf32>
    %95 = arith.mulf %26, %56 : vector<8x32xf32>
    %96 = arith.addf %23, %95 : vector<8x32xf32>
    %cst_51 = arith.constant 1.000000e+00 : f32
    %97 = vector.broadcast %cst_51 : f32 to vector<8x32xf32>
    %98 = arith.mulf %97, %94 : vector<8x32xf32>
    %99 = arith.mulf %98, %56 : vector<8x32xf32>
    %100 = arith.mulf %99, %79 : vector<8x32xf32>
    %101 = arith.subf %96, %100 : vector<8x32xf32>
    %cst_52 = arith.constant dense<0.000000e+00> : vector<8x32xf32>
    %102 = tpu.matmul %79, %27, %cst_52 {dimension_numbers = #tpu.dot_dimension_numbers<[1], [0], [0], [1], [0, 0, 1, 1], [], []>} : vector<8x32xf32>, vector<32x32xf32>, vector<8x32xf32> -> vector<8x32xf32>
    %103 = arith.mulf %94, %101 : vector<8x32xf32>
    %104 = arith.mulf %103, %79 : vector<8x32xf32>
    %cst_53 = arith.constant dense<0.000000e+00> : vector<8x32xf32>
    %105 = tpu.matmul %104, %28, %cst_53 {dimension_numbers = #tpu.dot_dimension_numbers<[1], [0], [0], [1], [0, 0, 1, 1], [], []>} : vector<8x32xf32>, vector<32x32xf32>, vector<8x32xf32> -> vector<8x32xf32>
    %c1 = arith.constant 1 : index
    %c0_54 = arith.constant 0 : index
    %c0_55 = arith.constant 0 : index
    %106 = vector.load %arg16[%c1, %c0_54, %c0_55] : memref<8x8x32xf32, #tpu.memory_space<vmem>>, vector<1x8x32xf32>
    %107 = vector.shape_cast %106 : vector<1x8x32xf32> to vector<8x32xf32>
    %108 = arith.addf %102, %107 : vector<8x32xf32>
    %109 = arith.negf %108 : vector<8x32xf32>
    %110 = math.exp %109 : vector<8x32xf32>
    %cst_56 = arith.constant 1.000000e+00 : f32
    %111 = vector.broadcast %cst_56 : f32 to vector<8x32xf32>
    %112 = arith.addf %111, %110 : vector<8x32xf32>
    %113 = arith.divf %111, %112 : vector<8x32xf32>
    %c1_57 = arith.constant 1 : index
    %c0_58 = arith.constant 0 : index
    %c0_59 = arith.constant 0 : index
    %114 = vector.load %arg17[%c1_57, %c0_58, %c0_59] : memref<8x8x32xf32, #tpu.memory_space<vmem>>, vector<1x8x32xf32>
    %115 = vector.shape_cast %114 : vector<1x8x32xf32> to vector<8x32xf32>
    %116 = arith.addf %105, %115 : vector<8x32xf32>
    %117 = arith.negf %116 : vector<8x32xf32>
    %118 = math.exp %117 : vector<8x32xf32>
    %cst_60 = arith.constant 1.000000e+00 : f32
    %119 = vector.broadcast %cst_60 : f32 to vector<8x32xf32>
    %120 = arith.addf %119, %118 : vector<8x32xf32>
    %121 = arith.divf %119, %120 : vector<8x32xf32>
    %122 = arith.subf %121, %79 : vector<8x32xf32>
    %123 = arith.mulf %113, %122 : vector<8x32xf32>
    %124 = arith.addf %79, %123 : vector<8x32xf32>
    %c1_61 = arith.constant 1 : index
    %c0_62 = arith.constant 0 : index
    %c0_63 = arith.constant 0 : index
    %125 = vector.load %arg13[%c1_61, %c0_62, %c0_63] : memref<8x8x32xf32, #tpu.memory_space<vmem>>, vector<1x8x32xf32>
    %126 = vector.shape_cast %125 : vector<1x8x32xf32> to vector<8x32xf32>
    %127 = vector.shape_cast %124 : vector<8x32xf32> to vector<1x8x32xf32>
    tpu.vector_store %arg13[%c1_61, %c0_62, %c0_63], %127 {strides = array<i32>} : memref<8x8x32xf32, #tpu.memory_space<vmem>>, vector<1x8x32xf32>,
    %128 = arith.mulf %20, %94 : vector<8x32xf32>
    %129 = arith.addf %17, %128 : vector<8x32xf32>
    %cst_64 = arith.constant 1.000000e+00 : f32
    %130 = vector.broadcast %cst_64 : f32 to vector<8x32xf32>
    %131 = arith.mulf %130, %14 : vector<8x32xf32>
    %cst_65 = arith.constant 1.000000e+00 : f32
    %132 = vector.broadcast %cst_65 : f32 to vector<8x32xf32>
    %133 = arith.subf %132, %94 : vector<8x32xf32>
    %134 = arith.mulf %131, %133 : vector<8x32xf32>
    %135 = arith.mulf %134, %124 : vector<8x32xf32>
    %136 = arith.addf %129, %135 : vector<8x32xf32>
    %137 = arith.maximumf %136, %14 : vector<8x32xf32>
    %cst_66 = arith.constant 1.000000e+00 : f32
    %138 = vector.broadcast %cst_66 : f32 to vector<8x32xf32>
    %139 = arith.minimumf %137, %138 : vector<8x32xf32>
    %140 = arith.mulf %26, %101 : vector<8x32xf32>
    %141 = arith.addf %23, %140 : vector<8x32xf32>
    %cst_67 = arith.constant 1.000000e+00 : f32
    %142 = vector.broadcast %cst_67 : f32 to vector<8x32xf32>
    %143 = arith.mulf %142, %139 : vector<8x32xf32>
    %144 = arith.mulf %143, %101 : vector<8x32xf32>
    %145 = arith.mulf %144, %124 : vector<8x32xf32>
    %146 = arith.subf %141, %145 : vector<8x32xf32>
    %cst_68 = arith.constant dense<0.000000e+00> : vector<8x32xf32>
    %147 = tpu.matmul %124, %27, %cst_68 {dimension_numbers = #tpu.dot_dimension_numbers<[1], [0], [0], [1], [0, 0, 1, 1], [], []>} : vector<8x32xf32>, vector<32x32xf32>, vector<8x32xf32> -> vector<8x32xf32>
    %148 = arith.mulf %139, %146 : vector<8x32xf32>
    %149 = arith.mulf %148, %124 : vector<8x32xf32>
    %cst_69 = arith.constant dense<0.000000e+00> : vector<8x32xf32>
    %150 = tpu.matmul %149, %28, %cst_69 {dimension_numbers = #tpu.dot_dimension_numbers<[1], [0], [0], [1], [0, 0, 1, 1], [], []>} : vector<8x32xf32>, vector<32x32xf32>, vector<8x32xf32> -> vector<8x32xf32>
    %c2 = arith.constant 2 : index
    %c0_70 = arith.constant 0 : index
    %c0_71 = arith.constant 0 : index
    %151 = vector.load %arg16[%c2, %c0_70, %c0_71] : memref<8x8x32xf32, #tpu.memory_space<vmem>>, vector<1x8x32xf32>
    %152 = vector.shape_cast %151 : vector<1x8x32xf32> to vector<8x32xf32>
    %153 = arith.addf %147, %152 : vector<8x32xf32>
    %154 = arith.negf %153 : vector<8x32xf32>
    %155 = math.exp %154 : vector<8x32xf32>
    %cst_72 = arith.constant 1.000000e+00 : f32
    %156 = vector.broadcast %cst_72 : f32 to vector<8x32xf32>
    %157 = arith.addf %156, %155 : vector<8x32xf32>
    %158 = arith.divf %156, %157 : vector<8x32xf32>
    %c2_73 = arith.constant 2 : index
    %c0_74 = arith.constant 0 : index
    %c0_75 = arith.constant 0 : index
    %159 = vector.load %arg17[%c2_73, %c0_74, %c0_75] : memref<8x8x32xf32, #tpu.memory_space<vmem>>, vector<1x8x32xf32>
    %160 = vector.shape_cast %159 : vector<1x8x32xf32> to vector<8x32xf32>
    %161 = arith.addf %150, %160 : vector<8x32xf32>
    %162 = arith.negf %161 : vector<8x32xf32>
    %163 = math.exp %162 : vector<8x32xf32>
    %cst_76 = arith.constant 1.000000e+00 : f32
    %164 = vector.broadcast %cst_76 : f32 to vector<8x32xf32>
    %165 = arith.addf %164, %163 : vector<8x32xf32>
    %166 = arith.divf %164, %165 : vector<8x32xf32>
    %167 = arith.subf %166, %124 : vector<8x32xf32>
    %168 = arith.mulf %158, %167 : vector<8x32xf32>
    %169 = arith.addf %124, %168 : vector<8x32xf32>
    %c2_77 = arith.constant 2 : index
    %c0_78 = arith.constant 0 : index
    %c0_79 = arith.constant 0 : index
    %170 = vector.load %arg13[%c2_77, %c0_78, %c0_79] : memref<8x8x32xf32, #tpu.memory_space<vmem>>, vector<1x8x32xf32>
    %171 = vector.shape_cast %170 : vector<1x8x32xf32> to vector<8x32xf32>
    %172 = vector.shape_cast %169 : vector<8x32xf32> to vector<1x8x32xf32>
    tpu.vector_store %arg13[%c2_77, %c0_78, %c0_79], %172 {strides = array<i32>} : memref<8x8x32xf32, #tpu.memory_space<vmem>>, vector<1x8x32xf32>,
    %173 = arith.mulf %20, %139 : vector<8x32xf32>
    %174 = arith.addf %17, %173 : vector<8x32xf32>
    %cst_80 = arith.constant 1.000000e+00 : f32
    %175 = vector.broadcast %cst_80 : f32 to vector<8x32xf32>
    %176 = arith.mulf %175, %14 : vector<8x32xf32>
    %cst_81 = arith.constant 1.000000e+00 : f32
    %177 = vector.broadcast %cst_81 : f32 to vector<8x32xf32>
    %178 = arith.subf %177, %139 : vector<8x32xf32>
    %179 = arith.mulf %176, %178 : vector<8x32xf32>
    %180 = arith.mulf %179, %169 : vector<8x32xf32>
    %181 = arith.addf %174, %180 : vector<8x32xf32>
    %182 = arith.maximumf %181, %14 : vector<8x32xf32>
    %cst_82 = arith.constant 1.000000e+00 : f32
    %183 = vector.broadcast %cst_82 : f32 to vector<8x32xf32>
    %184 = arith.minimumf %182, %183 : vector<8x32xf32>
    %185 = arith.mulf %26, %146 : vector<8x32xf32>
    %186 = arith.addf %23, %185 : vector<8x32xf32>
    %cst_83 = arith.constant 1.000000e+00 : f32
    %187 = vector.broadcast %cst_83 : f32 to vector<8x32xf32>
    %188 = arith.mulf %187, %184 : vector<8x32xf32>
    %189 = arith.mulf %188, %146 : vector<8x32xf32>
    %190 = arith.mulf %189, %169 : vector<8x32xf32>
    %191 = arith.subf %186, %190 : vector<8x32xf32>
    %cst_84 = arith.constant dense<0.000000e+00> : vector<8x32xf32>
    %192 = tpu.matmul %169, %27, %cst_84 {dimension_numbers = #tpu.dot_dimension_numbers<[1], [0], [0], [1], [0, 0, 1, 1], [], []>} : vector<8x32xf32>, vector<32x32xf32>, vector<8x32xf32> -> vector<8x32xf32>
    %193 = arith.mulf %184, %191 : vector<8x32xf32>
    %194 = arith.mulf %193, %169 : vector<8x32xf32>
    %cst_85 = arith.constant dense<0.000000e+00> : vector<8x32xf32>
    %195 = tpu.matmul %194, %28, %cst_85 {dimension_numbers = #tpu.dot_dimension_numbers<[1], [0], [0], [1], [0, 0, 1, 1], [], []>} : vector<8x32xf32>, vector<32x32xf32>, vector<8x32xf32> -> vector<8x32xf32>
    %c3 = arith.constant 3 : index
    %c0_86 = arith.constant 0 : index
    %c0_87 = arith.constant 0 : index
    %196 = vector.load %arg16[%c3, %c0_86, %c0_87] : memref<8x8x32xf32, #tpu.memory_space<vmem>>, vector<1x8x32xf32>
    %197 = vector.shape_cast %196 : vector<1x8x32xf32> to vector<8x32xf32>
    %198 = arith.addf %192, %197 : vector<8x32xf32>
    %199 = arith.negf %198 : vector<8x32xf32>
    %200 = math.exp %199 : vector<8x32xf32>
    %cst_88 = arith.constant 1.000000e+00 : f32
    %201 = vector.broadcast %cst_88 : f32 to vector<8x32xf32>
    %202 = arith.addf %201, %200 : vector<8x32xf32>
    %203 = arith.divf %201, %202 : vector<8x32xf32>
    %c3_89 = arith.constant 3 : index
    %c0_90 = arith.constant 0 : index
    %c0_91 = arith.constant 0 : index
    %204 = vector.load %arg17[%c3_89, %c0_90, %c0_91] : memref<8x8x32xf32, #tpu.memory_space<vmem>>, vector<1x8x32xf32>
    %205 = vector.shape_cast %204 : vector<1x8x32xf32> to vector<8x32xf32>
    %206 = arith.addf %195, %205 : vector<8x32xf32>
    %207 = arith.negf %206 : vector<8x32xf32>
    %208 = math.exp %207 : vector<8x32xf32>
    %cst_92 = arith.constant 1.000000e+00 : f32
    %209 = vector.broadcast %cst_92 : f32 to vector<8x32xf32>
    %210 = arith.addf %209, %208 : vector<8x32xf32>
    %211 = arith.divf %209, %210 : vector<8x32xf32>
    %212 = arith.subf %211, %169 : vector<8x32xf32>
    %213 = arith.mulf %203, %212 : vector<8x32xf32>
    %214 = arith.addf %169, %213 : vector<8x32xf32>
    %c3_93 = arith.constant 3 : index
    %c0_94 = arith.constant 0 : index
    %c0_95 = arith.constant 0 : index
    %215 = vector.load %arg13[%c3_93, %c0_94, %c0_95] : memref<8x8x32xf32, #tpu.memory_space<vmem>>, vector<1x8x32xf32>
    %216 = vector.shape_cast %215 : vector<1x8x32xf32> to vector<8x32xf32>
    %217 = vector.shape_cast %214 : vector<8x32xf32> to vector<1x8x32xf32>
    tpu.vector_store %arg13[%c3_93, %c0_94, %c0_95], %217 {strides = array<i32>} : memref<8x8x32xf32, #tpu.memory_space<vmem>>, vector<1x8x32xf32>,
    %218 = arith.mulf %20, %184 : vector<8x32xf32>
    %219 = arith.addf %17, %218 : vector<8x32xf32>
    %cst_96 = arith.constant 1.000000e+00 : f32
    %220 = vector.broadcast %cst_96 : f32 to vector<8x32xf32>
    %221 = arith.mulf %220, %14 : vector<8x32xf32>
    %cst_97 = arith.constant 1.000000e+00 : f32
    %222 = vector.broadcast %cst_97 : f32 to vector<8x32xf32>
    %223 = arith.subf %222, %184 : vector<8x32xf32>
    %224 = arith.mulf %221, %223 : vector<8x32xf32>
    %225 = arith.mulf %224, %214 : vector<8x32xf32>
    %226 = arith.addf %219, %225 : vector<8x32xf32>
    %227 = arith.maximumf %226, %14 : vector<8x32xf32>
    %cst_98 = arith.constant 1.000000e+00 : f32
    %228 = vector.broadcast %cst_98 : f32 to vector<8x32xf32>
    %229 = arith.minimumf %227, %228 : vector<8x32xf32>
    %230 = arith.mulf %26, %191 : vector<8x32xf32>
    %231 = arith.addf %23, %230 : vector<8x32xf32>
    %cst_99 = arith.constant 1.000000e+00 : f32
    %232 = vector.broadcast %cst_99 : f32 to vector<8x32xf32>
    %233 = arith.mulf %232, %229 : vector<8x32xf32>
    %234 = arith.mulf %233, %191 : vector<8x32xf32>
    %235 = arith.mulf %234, %214 : vector<8x32xf32>
    %236 = arith.subf %231, %235 : vector<8x32xf32>
    %cst_100 = arith.constant dense<0.000000e+00> : vector<8x32xf32>
    %237 = tpu.matmul %214, %27, %cst_100 {dimension_numbers = #tpu.dot_dimension_numbers<[1], [0], [0], [1], [0, 0, 1, 1], [], []>} : vector<8x32xf32>, vector<32x32xf32>, vector<8x32xf32> -> vector<8x32xf32>
    %238 = arith.mulf %229, %236 : vector<8x32xf32>
    %239 = arith.mulf %238, %214 : vector<8x32xf32>
    %cst_101 = arith.constant dense<0.000000e+00> : vector<8x32xf32>
    %240 = tpu.matmul %239, %28, %cst_101 {dimension_numbers = #tpu.dot_dimension_numbers<[1], [0], [0], [1], [0, 0, 1, 1], [], []>} : vector<8x32xf32>, vector<32x32xf32>, vector<8x32xf32> -> vector<8x32xf32>
    %c4 = arith.constant 4 : index
    %c0_102 = arith.constant 0 : index
    %c0_103 = arith.constant 0 : index
    %241 = vector.load %arg16[%c4, %c0_102, %c0_103] : memref<8x8x32xf32, #tpu.memory_space<vmem>>, vector<1x8x32xf32>
    %242 = vector.shape_cast %241 : vector<1x8x32xf32> to vector<8x32xf32>
    %243 = arith.addf %237, %242 : vector<8x32xf32>
    %244 = arith.negf %243 : vector<8x32xf32>
    %245 = math.exp %244 : vector<8x32xf32>
    %cst_104 = arith.constant 1.000000e+00 : f32
    %246 = vector.broadcast %cst_104 : f32 to vector<8x32xf32>
    %247 = arith.addf %246, %245 : vector<8x32xf32>
    %248 = arith.divf %246, %247 : vector<8x32xf32>
    %c4_105 = arith.constant 4 : index
    %c0_106 = arith.constant 0 : index
    %c0_107 = arith.constant 0 : index
    %249 = vector.load %arg17[%c4_105, %c0_106, %c0_107] : memref<8x8x32xf32, #tpu.memory_space<vmem>>, vector<1x8x32xf32>
    %250 = vector.shape_cast %249 : vector<1x8x32xf32> to vector<8x32xf32>
    %251 = arith.addf %240, %250 : vector<8x32xf32>
    %252 = arith.negf %251 : vector<8x32xf32>
    %253 = math.exp %252 : vector<8x32xf32>
    %cst_108 = arith.constant 1.000000e+00 : f32
    %254 = vector.broadcast %cst_108 : f32 to vector<8x32xf32>
    %255 = arith.addf %254, %253 : vector<8x32xf32>
    %256 = arith.divf %254, %255 : vector<8x32xf32>
    %257 = arith.subf %256, %214 : vector<8x32xf32>
    %258 = arith.mulf %248, %257 : vector<8x32xf32>
    %259 = arith.addf %214, %258 : vector<8x32xf32>
    %c4_109 = arith.constant 4 : index
    %c0_110 = arith.constant 0 : index
    %c0_111 = arith.constant 0 : index
    %260 = vector.load %arg13[%c4_109, %c0_110, %c0_111] : memref<8x8x32xf32, #tpu.memory_space<vmem>>, vector<1x8x32xf32>
    %261 = vector.shape_cast %260 : vector<1x8x32xf32> to vector<8x32xf32>
    %262 = vector.shape_cast %259 : vector<8x32xf32> to vector<1x8x32xf32>
    tpu.vector_store %arg13[%c4_109, %c0_110, %c0_111], %262 {strides = array<i32>} : memref<8x8x32xf32, #tpu.memory_space<vmem>>, vector<1x8x32xf32>,
    %263 = arith.mulf %20, %229 : vector<8x32xf32>
    %264 = arith.addf %17, %263 : vector<8x32xf32>
    %cst_112 = arith.constant 1.000000e+00 : f32
    %265 = vector.broadcast %cst_112 : f32 to vector<8x32xf32>
    %266 = arith.mulf %265, %14 : vector<8x32xf32>
    %cst_113 = arith.constant 1.000000e+00 : f32
    %267 = vector.broadcast %cst_113 : f32 to vector<8x32xf32>
    %268 = arith.subf %267, %229 : vector<8x32xf32>
    %269 = arith.mulf %266, %268 : vector<8x32xf32>
    %270 = arith.mulf %269, %259 : vector<8x32xf32>
    %271 = arith.addf %264, %270 : vector<8x32xf32>
    %272 = arith.maximumf %271, %14 : vector<8x32xf32>
    %cst_114 = arith.constant 1.000000e+00 : f32
    %273 = vector.broadcast %cst_114 : f32 to vector<8x32xf32>
    %274 = arith.minimumf %272, %273 : vector<8x32xf32>
    %275 = arith.mulf %26, %236 : vector<8x32xf32>
    %276 = arith.addf %23, %275 : vector<8x32xf32>
    %cst_115 = arith.constant 1.000000e+00 : f32
    %277 = vector.broadcast %cst_115 : f32 to vector<8x32xf32>
    %278 = arith.mulf %277, %274 : vector<8x32xf32>
    %279 = arith.mulf %278, %236 : vector<8x32xf32>
    %280 = arith.mulf %279, %259 : vector<8x32xf32>
    %281 = arith.subf %276, %280 : vector<8x32xf32>
    %cst_116 = arith.constant dense<0.000000e+00> : vector<8x32xf32>
    %282 = tpu.matmul %259, %27, %cst_116 {dimension_numbers = #tpu.dot_dimension_numbers<[1], [0], [0], [1], [0, 0, 1, 1], [], []>} : vector<8x32xf32>, vector<32x32xf32>, vector<8x32xf32> -> vector<8x32xf32>
    %283 = arith.mulf %274, %281 : vector<8x32xf32>
    %284 = arith.mulf %283, %259 : vector<8x32xf32>
    %cst_117 = arith.constant dense<0.000000e+00> : vector<8x32xf32>
    %285 = tpu.matmul %284, %28, %cst_117 {dimension_numbers = #tpu.dot_dimension_numbers<[1], [0], [0], [1], [0, 0, 1, 1], [], []>} : vector<8x32xf32>, vector<32x32xf32>, vector<8x32xf32> -> vector<8x32xf32>
    %c5 = arith.constant 5 : index
    %c0_118 = arith.constant 0 : index
    %c0_119 = arith.constant 0 : index
    %286 = vector.load %arg16[%c5, %c0_118, %c0_119] : memref<8x8x32xf32, #tpu.memory_space<vmem>>, vector<1x8x32xf32>
    %287 = vector.shape_cast %286 : vector<1x8x32xf32> to vector<8x32xf32>
    %288 = arith.addf %282, %287 : vector<8x32xf32>
    %289 = arith.negf %288 : vector<8x32xf32>
    %290 = math.exp %289 : vector<8x32xf32>
    %cst_120 = arith.constant 1.000000e+00 : f32
    %291 = vector.broadcast %cst_120 : f32 to vector<8x32xf32>
    %292 = arith.addf %291, %290 : vector<8x32xf32>
    %293 = arith.divf %291, %292 : vector<8x32xf32>
    %c5_121 = arith.constant 5 : index
    %c0_122 = arith.constant 0 : index
    %c0_123 = arith.constant 0 : index
    %294 = vector.load %arg17[%c5_121, %c0_122, %c0_123] : memref<8x8x32xf32, #tpu.memory_space<vmem>>, vector<1x8x32xf32>
    %295 = vector.shape_cast %294 : vector<1x8x32xf32> to vector<8x32xf32>
    %296 = arith.addf %285, %295 : vector<8x32xf32>
    %297 = arith.negf %296 : vector<8x32xf32>
    %298 = math.exp %297 : vector<8x32xf32>
    %cst_124 = arith.constant 1.000000e+00 : f32
    %299 = vector.broadcast %cst_124 : f32 to vector<8x32xf32>
    %300 = arith.addf %299, %298 : vector<8x32xf32>
    %301 = arith.divf %299, %300 : vector<8x32xf32>
    %302 = arith.subf %301, %259 : vector<8x32xf32>
    %303 = arith.mulf %293, %302 : vector<8x32xf32>
    %304 = arith.addf %259, %303 : vector<8x32xf32>
    %c5_125 = arith.constant 5 : index
    %c0_126 = arith.constant 0 : index
    %c0_127 = arith.constant 0 : index
    %305 = vector.load %arg13[%c5_125, %c0_126, %c0_127] : memref<8x8x32xf32, #tpu.memory_space<vmem>>, vector<1x8x32xf32>
    %306 = vector.shape_cast %305 : vector<1x8x32xf32> to vector<8x32xf32>
    %307 = vector.shape_cast %304 : vector<8x32xf32> to vector<1x8x32xf32>
    tpu.vector_store %arg13[%c5_125, %c0_126, %c0_127], %307 {strides = array<i32>} : memref<8x8x32xf32, #tpu.memory_space<vmem>>, vector<1x8x32xf32>,
    %308 = arith.mulf %20, %274 : vector<8x32xf32>
    %309 = arith.addf %17, %308 : vector<8x32xf32>
    %cst_128 = arith.constant 1.000000e+00 : f32
    %310 = vector.broadcast %cst_128 : f32 to vector<8x32xf32>
    %311 = arith.mulf %310, %14 : vector<8x32xf32>
    %cst_129 = arith.constant 1.000000e+00 : f32
    %312 = vector.broadcast %cst_129 : f32 to vector<8x32xf32>
    %313 = arith.subf %312, %274 : vector<8x32xf32>
    %314 = arith.mulf %311, %313 : vector<8x32xf32>
    %315 = arith.mulf %314, %304 : vector<8x32xf32>
    %316 = arith.addf %309, %315 : vector<8x32xf32>
    %317 = arith.maximumf %316, %14 : vector<8x32xf32>
    %cst_130 = arith.constant 1.000000e+00 : f32
    %318 = vector.broadcast %cst_130 : f32 to vector<8x32xf32>
    %319 = arith.minimumf %317, %318 : vector<8x32xf32>
    %320 = arith.mulf %26, %281 : vector<8x32xf32>
    %321 = arith.addf %23, %320 : vector<8x32xf32>
    %cst_131 = arith.constant 1.000000e+00 : f32
    %322 = vector.broadcast %cst_131 : f32 to vector<8x32xf32>
    %323 = arith.mulf %322, %319 : vector<8x32xf32>
    %324 = arith.mulf %323, %281 : vector<8x32xf32>
    %325 = arith.mulf %324, %304 : vector<8x32xf32>
    %326 = arith.subf %321, %325 : vector<8x32xf32>
    %cst_132 = arith.constant dense<0.000000e+00> : vector<8x32xf32>
    %327 = tpu.matmul %304, %27, %cst_132 {dimension_numbers = #tpu.dot_dimension_numbers<[1], [0], [0], [1], [0, 0, 1, 1], [], []>} : vector<8x32xf32>, vector<32x32xf32>, vector<8x32xf32> -> vector<8x32xf32>
    %328 = arith.mulf %319, %326 : vector<8x32xf32>
    %329 = arith.mulf %328, %304 : vector<8x32xf32>
    %cst_133 = arith.constant dense<0.000000e+00> : vector<8x32xf32>
    %330 = tpu.matmul %329, %28, %cst_133 {dimension_numbers = #tpu.dot_dimension_numbers<[1], [0], [0], [1], [0, 0, 1, 1], [], []>} : vector<8x32xf32>, vector<32x32xf32>, vector<8x32xf32> -> vector<8x32xf32>
    %c6 = arith.constant 6 : index
    %c0_134 = arith.constant 0 : index
    %c0_135 = arith.constant 0 : index
    %331 = vector.load %arg16[%c6, %c0_134, %c0_135] : memref<8x8x32xf32, #tpu.memory_space<vmem>>, vector<1x8x32xf32>
    %332 = vector.shape_cast %331 : vector<1x8x32xf32> to vector<8x32xf32>
    %333 = arith.addf %327, %332 : vector<8x32xf32>
    %334 = arith.negf %333 : vector<8x32xf32>
    %335 = math.exp %334 : vector<8x32xf32>
    %cst_136 = arith.constant 1.000000e+00 : f32
    %336 = vector.broadcast %cst_136 : f32 to vector<8x32xf32>
    %337 = arith.addf %336, %335 : vector<8x32xf32>
    %338 = arith.divf %336, %337 : vector<8x32xf32>
    %c6_137 = arith.constant 6 : index
    %c0_138 = arith.constant 0 : index
    %c0_139 = arith.constant 0 : index
    %339 = vector.load %arg17[%c6_137, %c0_138, %c0_139] : memref<8x8x32xf32, #tpu.memory_space<vmem>>, vector<1x8x32xf32>
    %340 = vector.shape_cast %339 : vector<1x8x32xf32> to vector<8x32xf32>
    %341 = arith.addf %330, %340 : vector<8x32xf32>
    %342 = arith.negf %341 : vector<8x32xf32>
    %343 = math.exp %342 : vector<8x32xf32>
    %cst_140 = arith.constant 1.000000e+00 : f32
    %344 = vector.broadcast %cst_140 : f32 to vector<8x32xf32>
    %345 = arith.addf %344, %343 : vector<8x32xf32>
    %346 = arith.divf %344, %345 : vector<8x32xf32>
    %347 = arith.subf %346, %304 : vector<8x32xf32>
    %348 = arith.mulf %338, %347 : vector<8x32xf32>
    %349 = arith.addf %304, %348 : vector<8x32xf32>
    %c6_141 = arith.constant 6 : index
    %c0_142 = arith.constant 0 : index
    %c0_143 = arith.constant 0 : index
    %350 = vector.load %arg13[%c6_141, %c0_142, %c0_143] : memref<8x8x32xf32, #tpu.memory_space<vmem>>, vector<1x8x32xf32>
    %351 = vector.shape_cast %350 : vector<1x8x32xf32> to vector<8x32xf32>
    %352 = vector.shape_cast %349 : vector<8x32xf32> to vector<1x8x32xf32>
    tpu.vector_store %arg13[%c6_141, %c0_142, %c0_143], %352 {strides = array<i32>} : memref<8x8x32xf32, #tpu.memory_space<vmem>>, vector<1x8x32xf32>,
    %353 = arith.mulf %20, %319 : vector<8x32xf32>
    %354 = arith.addf %17, %353 : vector<8x32xf32>
    %cst_144 = arith.constant 1.000000e+00 : f32
    %355 = vector.broadcast %cst_144 : f32 to vector<8x32xf32>
    %356 = arith.mulf %355, %14 : vector<8x32xf32>
    %cst_145 = arith.constant 1.000000e+00 : f32
    %357 = vector.broadcast %cst_145 : f32 to vector<8x32xf32>
    %358 = arith.subf %357, %319 : vector<8x32xf32>
    %359 = arith.mulf %356, %358 : vector<8x32xf32>
    %360 = arith.mulf %359, %349 : vector<8x32xf32>
    %361 = arith.addf %354, %360 : vector<8x32xf32>
    %362 = arith.maximumf %361, %14 : vector<8x32xf32>
    %cst_146 = arith.constant 1.000000e+00 : f32
    %363 = vector.broadcast %cst_146 : f32 to vector<8x32xf32>
    %364 = arith.minimumf %362, %363 : vector<8x32xf32>
    %365 = arith.mulf %26, %326 : vector<8x32xf32>
    %366 = arith.addf %23, %365 : vector<8x32xf32>
    %cst_147 = arith.constant 1.000000e+00 : f32
    %367 = vector.broadcast %cst_147 : f32 to vector<8x32xf32>
    %368 = arith.mulf %367, %364 : vector<8x32xf32>
    %369 = arith.mulf %368, %326 : vector<8x32xf32>
    %370 = arith.mulf %369, %349 : vector<8x32xf32>
    %371 = arith.subf %366, %370 : vector<8x32xf32>
    %cst_148 = arith.constant dense<0.000000e+00> : vector<8x32xf32>
    %372 = tpu.matmul %349, %27, %cst_148 {dimension_numbers = #tpu.dot_dimension_numbers<[1], [0], [0], [1], [0, 0, 1, 1], [], []>} : vector<8x32xf32>, vector<32x32xf32>, vector<8x32xf32> -> vector<8x32xf32>
    %373 = arith.mulf %364, %371 : vector<8x32xf32>
    %374 = arith.mulf %373, %349 : vector<8x32xf32>
    %cst_149 = arith.constant dense<0.000000e+00> : vector<8x32xf32>
    %375 = tpu.matmul %374, %28, %cst_149 {dimension_numbers = #tpu.dot_dimension_numbers<[1], [0], [0], [1], [0, 0, 1, 1], [], []>} : vector<8x32xf32>, vector<32x32xf32>, vector<8x32xf32> -> vector<8x32xf32>
    %c7 = arith.constant 7 : index
    %c0_150 = arith.constant 0 : index
    %c0_151 = arith.constant 0 : index
    %376 = vector.load %arg16[%c7, %c0_150, %c0_151] : memref<8x8x32xf32, #tpu.memory_space<vmem>>, vector<1x8x32xf32>
    %377 = vector.shape_cast %376 : vector<1x8x32xf32> to vector<8x32xf32>
    %378 = arith.addf %372, %377 : vector<8x32xf32>
    %379 = arith.negf %378 : vector<8x32xf32>
    %380 = math.exp %379 : vector<8x32xf32>
    %cst_152 = arith.constant 1.000000e+00 : f32
    %381 = vector.broadcast %cst_152 : f32 to vector<8x32xf32>
    %382 = arith.addf %381, %380 : vector<8x32xf32>
    %383 = arith.divf %381, %382 : vector<8x32xf32>
    %c7_153 = arith.constant 7 : index
    %c0_154 = arith.constant 0 : index
    %c0_155 = arith.constant 0 : index
    %384 = vector.load %arg17[%c7_153, %c0_154, %c0_155] : memref<8x8x32xf32, #tpu.memory_space<vmem>>, vector<1x8x32xf32>
    %385 = vector.shape_cast %384 : vector<1x8x32xf32> to vector<8x32xf32>
    %386 = arith.addf %375, %385 : vector<8x32xf32>
    %387 = arith.negf %386 : vector<8x32xf32>
    %388 = math.exp %387 : vector<8x32xf32>
    %cst_156 = arith.constant 1.000000e+00 : f32
    %389 = vector.broadcast %cst_156 : f32 to vector<8x32xf32>
    %390 = arith.addf %389, %388 : vector<8x32xf32>
    %391 = arith.divf %389, %390 : vector<8x32xf32>
    %392 = arith.subf %391, %349 : vector<8x32xf32>
    %393 = arith.mulf %383, %392 : vector<8x32xf32>
    %394 = arith.addf %349, %393 : vector<8x32xf32>
    %c7_157 = arith.constant 7 : index
    %c0_158 = arith.constant 0 : index
    %c0_159 = arith.constant 0 : index
    %395 = vector.load %arg13[%c7_157, %c0_158, %c0_159] : memref<8x8x32xf32, #tpu.memory_space<vmem>>, vector<1x8x32xf32>
    %396 = vector.shape_cast %395 : vector<1x8x32xf32> to vector<8x32xf32>
    %397 = vector.shape_cast %394 : vector<8x32xf32> to vector<1x8x32xf32>
    tpu.vector_store %arg13[%c7_157, %c0_158, %c0_159], %397 {strides = array<i32>} : memref<8x8x32xf32, #tpu.memory_space<vmem>>, vector<1x8x32xf32>,
    %c0_160 = arith.constant 0 : index
    %c0_161 = arith.constant 0 : index
    %398 = vector.load %arg14[%c0_160, %c0_161] : memref<8x32xf32, #tpu.memory_space<vmem>>, vector<8x32xf32>
    tpu.vector_store %arg14[%c0_160, %c0_161], %364 {strides = array<i32>} : memref<8x32xf32, #tpu.memory_space<vmem>>, vector<8x32xf32>,
    %c0_162 = arith.constant 0 : index
    %c0_163 = arith.constant 0 : index
    %399 = vector.load %arg15[%c0_162, %c0_163] : memref<8x32xf32, #tpu.memory_space<vmem>>, vector<8x32xf32>
    tpu.vector_store %arg15[%c0_162, %c0_163], %371 {strides = array<i32>} : memref<8x32xf32, #tpu.memory_space<vmem>>, vector<8x32xf32>,
    return
  }
}

</mosaic_0001>

<bundles_post_ra>
// kernel: stp_forward_seq.1
= control target key start
LH: loop header
LB: loop body
LE: loop exit
PB: predicated region body
PF: predicated region fallthrough
CT: control target
= control target key end

     0   :  { %21 = vsyncpa [#allocation5], 0  ;;  %vm66_vm0 = vcmask 130048   ;;  %v2380_v4 = vmov 0.0|0.0   ;;  %vm2381_vm1 = vmmov 0   ;;  %v2382_v10 = vmov 0.0   ;;  %s2864_s0 = inlined_call_operand.vmem [shape: f32[64,16], index: 0, kind: input, shape index: {}]   ;;  %s2865_s1 = inlined_call_operand.vmem [shape: f32[1,32], index: 1, kind: input, shape index: {}]   ;;  %s2866_s2 = inlined_call_operand.vmem [shape: f32[1,32], index: 2, kind: input, shape index: {}]   ;;  %s2867_s3 = inlined_call_operand.vmem [shape: f32[1,32], index: 3, kind: input, shape index: {}]   ;;  %s2868_s4 = inlined_call_operand.vmem [shape: f32[1,32], index: 4, kind: input, shape index: {}]   ;;  %s2869_s5 = inlined_call_operand.vmem [shape: f32[1,32], index: 5, kind: input, shape index: {}]   ;;  %s2870_s6 = inlined_call_operand.vmem [shape: f32[1,32], index: 6, kind: input, shape index: {}]   ;;  %s2871_s7 = inlined_call_operand.vmem [shape: f32[1,32], index: 7, kind: input, shape index: {}]   ;;  %s2872_s8 = inlined_call_operand.vmem [shape: f32[1,32], index: 8, kind: input, shape index: {}]   ;;  %s2873_s9 = inlined_call_operand.vmem [shape: f32[16,64], index: 9, kind: input, shape index: {}]   ;;  %s2874_s10 = inlined_call_operand.vmem [shape: f32[32,32], index: 10, kind: input, shape index: {}]   ;;  %s2875_s11 = inlined_call_operand.vmem [shape: f32[32,32], index: 11, kind: input, shape index: {}]   ;;  %s2876_s12 = inlined_call_operand.vmem [shape: f32[1,64], index: 12, kind: input, shape index: {}]   ;;  %s2877_s13 = inlined_call_operand.hbm [shape: f32[8,8,32], index: 13, kind: output, shape index: {0}]   ;;  %s2878_s14 = inlined_call_operand.hbm [shape: f32[8,32], index: 14, kind: output, shape index: {1}]   ;;  %s2879_s15 = inlined_call_operand.hbm [shape: f32[8,32], index: 15, kind: output, shape index: {2}]  }
   0x1   :  { %v57_v0 = vld [vmem:[%s2873_s9] sm:$0xff]  ;;  %v58_v1 = vld [vmem:[%s2873_s9 + $0x8] sm:$0xff]  ;;  %2141 = vmatprep.subr.bf16.mxu1 %v2380_v4  ;;  %v282_v8 = vld [vmem:[%s2874_s10 + $0x10] sm:$0xff]  ;;  %1969 = vmatprep.mubr.msk.f32.mxu1 %vm2381_vm1, %v2382_v10 }
   0x2   :  { %v49_v2 = vld [vmem:[%s2864_s0] sm:$0xff]  ;;  %v2137_v3 = vpack.c.bf16 %v58_v1, %v57_v0  ;;  %v281_v6 = vld [vmem:[%s2874_s10 + $0x8] sm:$0xff]  ;;  %v283_v9 = vld [vmem:[%s2874_s10 + $0x18] sm:$0xff] }
   0x3   :  { %1949 = vmatprep.mubr.msk.f32.mxu0 %vm66_vm0, %v49_v2  ;;  %v280_v5 = vld [vmem:[%s2874_s10] sm:$0xff]  ;;  %v50_v11 = vld [vmem:[%s2864_s0 + $0x8] sm:$0xff]  ;;  %v2505_v13 = vpack.c.bf16 %v283_v9, %v282_v8 }
   0x4   :  { %v2486_v7 = vpack.c.bf16 %v281_v6, %v280_v5  ;;  %2138 = vmatprep.subr.bf16.mxu0 %v2137_v3  ;;  %v2502_v12 = vld [vmem:[%s2870_s6] ss:$0 sm:$0xff]  ;;  %v285_v20 = vld [vmem:[%s2875_s11 + $0x8] sm:$0xff] }
   0x5   :  { %2140 = vmatpush3.bf16.msra.mxu0 %v2137_v3  ;;  %v2510_v14 = vld [vmem:[%s2868_s4] ss:$0 sm:$0xff] }
   0x6   :  { %2143 = vmatpush3.bf16.msra.mxu1 %v2486_v7  ;;  %v2515_v15 = vld [vmem:[%s2869_s5] ss:$0 sm:$0xff]  ;;  %2153 = vmatprep.subr.bf16.mxu0 %v2380_v4 }
   0x7   :  { %v1821_v16 = vld [vmem:[%s2866_s2] ss:$0 sm:$0xff]  ;;  %2144 = vmatprep.subr.bf16.mxu1 %v2380_v4 }
   0x8   :  { %v309_v17 = vmul.f32 %v1821_v16, %v2502_v12  ;;  %v311_v18 = vsub.f32 1.0, %v1821_v16  ;;  %v284_v19 = vld [vmem:[%s2875_s11] sm:$0xff] }
   0x9   :  { %22 = vsyncpa [#allocation7], 0  ;;  %1950 = vmatmul.mubr.msk.f32.vlgmr.msra.gmra.mrb[0].mxu0 %vm66_vm0, %v50_v11  ;;  %vm196_vm2 = vcmask 261120   ;;  %v2536_v23 = vld [vmem:[%s2865_s1] ss:$0 sm:$0xff]  ;;  %v2538_v24 = vpack.c.bf16 %v285_v20, %v284_v19  ;;  %v286_v26 = vld [vmem:[%s2875_s11 + $0x10] sm:$0xff] }
   0xa   :  { %v310_v21 = vadd.f32 %v2515_v15, %v309_v17  ;;  %v312_v22 = vmul.f32 %v2510_v14, %v311_v18  ;;  %2146 = vmatpush3.bf16.msra.mxu1 %v2505_v13  ;;  %2155 = vmatpush3.bf16.msra.mxu0 %v2486_v7  ;;  %v287_v27 = vld [vmem:[%s2875_s11 + $0x18] sm:$0xff]  ;;  %v2553_v28 = vld [vmem:[%s2872_s8] ss:$0 sm:$0xff]  ;;  %s2383_s18 = smov 96   ;;  %v51_v49 = vld [vmem:[%s2864_s0 + $0x10] sm:$0xff] }
   0xb   :  { %2147 = vmatprep.subr.bf16.mxu1 %v2380_v4  ;;  %2156 = vmatprep.subr.bf16.mxu0 %v2380_v4  ;;  %v1822_v29 = vld [vmem:[%s2867_s3] ss:$0 sm:$0xff]  ;;  %v2561_v31 = vpack.c.bf16 %v287_v27, %v286_v26  ;;  %v52_v51 = vld [vmem:[%s2864_s0 + $0x18] sm:$0xff]  ;;  %v54_v54 = vld [vmem:[%s2864_s0 + $0x28] sm:$0xff] }
   0xc   :  { %v313_v25 = vmul.f32 %v2536_v23, %v312_v22  ;;  %v317_v33 = vmul.f32 %v1822_v29, %v2553_v28  ;;  %v2572_v34 = vld [vmem:[%s2871_s7] ss:$0 sm:$0xff]  ;;  %1952 = vmatprep.mubr.msk.f32.mxu0 %vm66_vm0, %v51_v49  ;;  %v55_v55 = vld [vmem:[%s2864_s0 + $0x30] sm:$0xff]  ;;  %v56_v56 = vld [vmem:[%s2864_s0 + $0x38] sm:$0xff] }
   0xd   :  { %1970 = vmatmul.mubr.msk.f32.vlgmr.msra.gmra.mrb[0].mxu1 %vm196_vm2, %v2536_v23  ;;  %v2597_v42 = vld [vmem:[%s2876_s12] ss:$0 sm:$0xff]  ;;  %1953 = vmatmul.mubr.msk.f32.gmra.mrb[2].mxu0 %vm66_vm0, %v52_v51 }
   0xe   :  { %v314_v30 = vadd.f32 %v313_v25, %v310_v21  ;;  %2149 = vmatpush3.bf16.msra.mxu1 %v2538_v24  ;;  %1980 = vmatprep.mubr.msk.f32.mxu1 %vm2381_vm1, %v2382_v10  ;;  %v318_v37 = vadd.f32 %v2572_v34, %v317_v33  ;;  %v53_v53 = vld [vmem:[%s2864_s0 + $0x20] sm:$0xff]  ;;  %s2384_s0 = smov [#allocation6]  }
   0xf   :  { %2150 = vmatprep.subr.bf16.mxu1 %v2380_v4  ;;  %2158 = vmatpush3.bf16.msra.mxu0 %v2505_v13  ;;  %s1781_s2 = sshll.u32 %s2384_s0, 4  ;;  %s1782_s2 = int_to_ptr.vmem [resolvable:$true] %s1781_s2 }
  0x10   :  { %v315_v32 = vmax.f32 %v314_v30, %v2510_v14  ;;  %2165 = vmatprep.subr.bf16.mxu0 %v2380_v4  ;;  %1955 = vmatprep.mubr.msk.f32.mxu0 %vm66_vm0, %v53_v53  ;;  %s2310_s5 = scalar_lea.vmem %s1782_s2, 128  ;;  %p2315_p1 = scmp.lt.s32.totalorder %s1782_s2, %s1782_s2 }
  0x11   :  { %1956 = vmatmul.mubr.msk.f32.gmra.mrb[4].mxu0 %vm66_vm0, %v54_v54  ;;  %p2311_p0 = scmp.ne.s32.totalorder %s1782_s2, %s2310_s5  ;;  %p2316_p2 = scmp.lt.s32.totalorder %s2310_s5, %s2310_s5 }
  0x12   :  { %v2575_v35 = vmin.f32 %v315_v32, 1.0  ;;  %2152 = vmatpush3.bf16.msra.mxu1 %v2561_v31  ;;  %1958 = vmatprep.mubr.msk.f32.mxu0 %vm66_vm0, %v55_v55 }
  0x13   :  { %2159 = vmatprep.subr.bf16.mxu1 %v2380_v4  ;;  %p2317_p3 = por %p2316_p2, %p2315_p1 }
  0x14   :  { %v319_v36 = vmul.f32 %v1822_v29, %v2575_v35  ;;  %v489_v6 = vsub.f32 1.0, %v2575_v35  ;;  %v487_v11 = vmul.f32 %v2502_v12, %v2575_v35 }
  0x15   :  { %1959 = vmatmul.mubr.msk.f32.gmra.mrb[6].mxu0 %vm66_vm0, %v56_v56  ;;  %p2318_p4 = pnand %p2317_p3, %p2311_p0 }
  0x16   :  { %v320_v38 = vmul.f32 %v2536_v23, %v319_v36  ;;  %1991 = vmatprep.mubr.msk.f32.mxu0 %vm2381_vm1, %v2382_v10  ;;  %v490_v18 = vmul.f32 %v2510_v14, %v489_v6  ;;  %v488_v20 = vadd.f32 %v2515_v15, %v487_v11 }
  0x18   :  { %v2582_v39 = vsub.f32 %v318_v37, %v320_v38 }
  0x1a   :  { %v322_v40 = vmul.f32 %v2582_v39, %v2575_v35  ;;  %v495_v25 = vmul.f32 %v2553_v28, %v2582_v39 }
  0x1c   :  { %v323_v41 = vmul.f32 %v2536_v23, %v322_v40  ;;  %v496_v27 = vadd.f32 %v2572_v34, %v495_v25 }
  0x1e   :  { %1981 = vmatmul.mubr.msk.f32.vlgmr.msra.gmra.mrb[2].mxu1 %vm196_vm2, %v323_v41 }
  0x1f   :  { %2161 = vmatpush3.bf16.msra.mxu1 %v2538_v24  ;;  %2002 = vmatprep.mubr.msk.f32.mxu1 %vm2381_vm1, %v2382_v10 }
  0x20   :  { %2162 = vmatprep.subr.bf16.mxu1 %v2380_v4 }
  0x23   :  { %2164 = vmatpush3.bf16.msra.mxu1 %v2561_v31 }
  0x24   :  { %2171 = vmatprep.subr.bf16.mxu1 %v2380_v4 }
  0xdc   :  { %v1951_v43 = vpop.f32.mrb[0].mxu0 }
  0xdd   :  { %v163_v44 = vadd.f32 %v1951_v43, %v2597_v42  ;;  %v157_v45 = vpop.f32.mrb[1].mxu0 }
  0xde   :  { %v158_v46 = vadd.f32 %v2597_v42, %v157_v45 }
  0xdf   :  { %198 = vst.msk [vmem:[#allocation2 + $0x8] sm:$0xff] %vm196_vm2, %v163_v44 }
  0xe0   :  { %197 = vst.msk [vmem:[#allocation2] sm:$0xff] %vm196_vm2, %v158_v46  ;;  %213 = vrot.lane.b32.xlu0 %v158_v46, %s2383_s18  ;;  %v393_v47 = vpop.f32.mrb[0].mxu1  ;;  %v1954_v36 = vpop.f32.mrb[2].mxu0 }
  0xe1   :  { %v1971_v48 = vpop.f32.mrb[1].mxu1  ;;  %v173_v37 = vadd.f32 %v1954_v36, %v2597_v42  ;;  %v167_v38 = vpop.f32.mrb[3].mxu0 }
  0xe3   :  { %200 = vst.msk [vmem:[#allocation2 + $0x18] sm:$0xff] %vm196_vm2, %v173_v37 }
  0xe4   :  { %215 = vrot.lane.b32.xlu0 %v163_v44, %s2383_s18  ;;  %v1957_v40 = vpop.f32.mrb[4].mxu0 }
  0xe5   :  { %v183_v41 = vadd.f32 %v1957_v40, %v2597_v42  ;;  %v177_v43 = vpop.f32.mrb[5].mxu0 }
  0xe6   :  { %v178_v44 = vadd.f32 %v2597_v42, %v177_v43  ;;  %v503_v56 = vld [vmem:[#allocation2 + $0x8] sm:$0xff] }
  0xe7   :  { %v324_v57 = vld [vmem:[#allocation2] sm:$0xff]  ;;  %202 = vst.msk [vmem:[#allocation2 + $0x28] sm:$0xff] %vm196_vm2, %v183_v41 }
  0xe8   :  { %v394_v59 = vadd.f32 %v393_v47, %v324_v57  ;;  %201 = vst.msk [vmem:[#allocation2 + $0x20] sm:$0xff] %vm196_vm2, %v178_v44  ;;  %v1960_v45 = vpop.f32.mrb[6].mxu0  ;;  %221 = vrot.lane.b32.xlu0 %v178_v44, %s2383_s18 }
  0xe9   :  { %v193_v46 = vadd.f32 %v1960_v45, %v2597_v42  ;;  %v187_v47 = vpop.f32.mrb[7].mxu0 }
  0xea   :  { %v1824_v61 = vmul.f32 -1.442695, %v394_v59  ;;  %v188_v48 = vadd.f32 %v2597_v42, %v187_v47 }
  0xeb   :  { %204 = vst.msk [vmem:[#allocation2 + $0x38] sm:$0xff] %vm196_vm2, %v193_v46 }
  0xec   :  { %2246 = vpow2.f32 %v1824_v61  ;;  %203 = vst.msk [vmem:[#allocation2 + $0x30] sm:$0xff] %vm196_vm2, %v188_v48  ;;  %225 = vrot.lane.b32.xlu0 %v188_v48, %s2383_s18 }
  0xf1   :  { %v473_v50 = vpop.f32.mrb[2].mxu1 }
  0xf2   :  { %v1982_v52 = vpop.f32.mrb[3].mxu1 }
  0xf6   :  { %v2247_v1 = vpop.eup %2246 }
  0xf7   :  { %v400_v3 = vadd.f32 1.0, %v2247_v1 }
 0x152   :  { %v214_v58 = vpop.permute.xlu0 %213 }
 0x153   :  { %237 = vst.msk [vmem:[#allocation3] sm:$0xff] %vm196_vm2, %v214_v58 }
 0x156   :  { %v216_v60 = vpop.permute.xlu0 %215 }
 0x157   :  { %238 = vst.msk [vmem:[#allocation3 + $0x8] sm:$0xff] %vm196_vm2, %v216_v60 }
 0x15a   :  { %v403_v62 = vld [vmem:[#allocation3] sm:$0xff]  ;;  %v222_v51 = vpop.permute.xlu0 %221 }
 0x15b   :  { %v474_v63 = vadd.f32 %v473_v50, %v403_v62  ;;  %241 = vst.msk [vmem:[#allocation3 + $0x20] sm:$0xff] %vm196_vm2, %v222_v51 }
 0x15d   :  { %v1826_v0 = vmul.f32 -1.442695, %v474_v63 }
 0x15e   :  { %v226_v52 = vpop.permute.xlu0 %225  ;;  %v584_v59 = vld [vmem:[#allocation3 + $0x8] sm:$0xff] }
 0x15f   :  { %2248 = vpow2.f32 %v1826_v0  ;;  %243 = vst.msk [vmem:[#allocation3 + $0x30] sm:$0xff] %vm196_vm2, %v226_v52 }
 0x169   :  { %v2249_v2 = vpop.eup %2248 }
 0x16a   :  { %v480_v5 = vadd.f32 1.0, %v2249_v2 }
 0x16c   :  { %2250 = vrcp.f32 %v480_v5 }
 0x16d   :  { %2252 = vrcp.f32 %v400_v3 }
 0x176   :  { %v2251_v8 = vpop.eup %2250 }
 0x177   :  { %v483_v9 = vsub.f32 %v2251_v8, %v2536_v23  ;;  %v2253_v16 = vpop.eup %2252 }
 0x179   :  { %v484_v17 = vmul.f32 %v2253_v16, %v483_v9 }
 0x17b   :  { %v2639_v19 = vadd.f32 %v2536_v23, %v484_v17 }
 0x17d   :  { %486 = vst.msk [vmem:[#allocation4] sm:$0xff] %vm196_vm2, %v2639_v19  ;;  %1992 = vmatmul.mubr.msk.f32.vlgmr.msra.gmra.mrb[8].mxu0 %vm196_vm2, %v2639_v19  ;;  %v491_v21 = vmul.f32 %v490_v18, %v2639_v19 }
 0x17e   :  { %2167 = vmatpush3.bf16.msra.mxu0 %v2486_v7  ;;  %2013 = vmatprep.mubr.msk.f32.mxu0 %vm2381_vm1, %v2382_v10 }
 0x17f   :  { %v492_v22 = vadd.f32 %v491_v21, %v488_v20  ;;  %2168 = vmatprep.subr.bf16.mxu0 %v2380_v4 }
 0x181   :  { %v493_v23 = vmax.f32 %v492_v22, %v2510_v14 }
 0x182   :  { %2170 = vmatpush3.bf16.msra.mxu0 %v2505_v13 }
 0x183   :  { %v2655_v26 = vmin.f32 %v493_v23, 1.0  ;;  %2177 = vmatprep.subr.bf16.mxu0 %v2380_v4 }
 0x185   :  { %v497_v29 = vmul.f32 %v2655_v26, %v2582_v39  ;;  %v168_v39 = vadd.f32 %v2597_v42, %v167_v38  ;;  %v671_v6 = vsub.f32 1.0, %v2655_v26  ;;  %v669_v16 = vmul.f32 %v2502_v12, %v2655_v26 }
 0x187   :  { %v498_v30 = vmul.f32 %v497_v29, %v2639_v19  ;;  %199 = vst.msk [vmem:[#allocation2 + $0x10] sm:$0xff] %vm196_vm2, %v168_v39  ;;  %217 = vrot.lane.b32.xlu1 %v168_v39, %s2383_s18  ;;  %v672_v18 = vmul.f32 %v2510_v14, %v671_v6  ;;  %v670_v20 = vadd.f32 %v2515_v15, %v669_v16 }
 0x189   :  { %v2662_v32 = vsub.f32 %v496_v27, %v498_v30 }
 0x18b   :  { %v500_v33 = vmul.f32 %v2662_v32, %v2655_v26  ;;  %219 = vrot.lane.b32.xlu1 %v173_v37, %s2383_s18  ;;  %v677_v25 = vmul.f32 %v2553_v28, %v2662_v32 }
 0x18d   :  { %v501_v35 = vmul.f32 %v500_v33, %v2639_v19  ;;  %v678_v27 = vadd.f32 %v2572_v34, %v677_v25 }
 0x18e   :  { %v685_v37 = vld [vmem:[#allocation2 + $0x10] sm:$0xff] }
 0x18f   :  { %2003 = vmatmul.mubr.msk.f32.vlgmr.msra.gmra.mrb[4].mxu1 %vm196_vm2, %v501_v35  ;;  %223 = vrot.lane.b32.xlu1 %v183_v41, %s2383_s18 }
 0x190   :  { %2173 = vmatpush3.bf16.msra.mxu1 %v2538_v24  ;;  %2024 = vmatprep.mubr.msk.f32.mxu1 %vm2381_vm1, %v2382_v10 }
 0x191   :  { %2174 = vmatprep.subr.bf16.mxu1 %v2380_v4 }
 0x193   :  { %227 = vrot.lane.b32.xlu1 %v193_v46, %s2383_s18 }
 0x194   :  { %2176 = vmatpush3.bf16.msra.mxu1 %v2561_v31 }
 0x195   :  { %2183 = vmatprep.subr.bf16.mxu1 %v2380_v4 }
 0x1f9   :  { %v218_v49 = vpop.permute.xlu1 %217 }
 0x1fa   :  { %239 = vst.msk [vmem:[#allocation3 + $0x10] sm:$0xff] %vm196_vm2, %v218_v49 }
 0x1fd   :  { %v220_v50 = vpop.permute.xlu1 %219 }
 0x1fe   :  { %240 = vst.msk [vmem:[#allocation3 + $0x18] sm:$0xff] %vm196_vm2, %v220_v50 }
 0x201   :  { %v224_v42 = vpop.permute.xlu1 %223  ;;  %v766_v40 = vld [vmem:[#allocation3 + $0x10] sm:$0xff] }
 0x202   :  { %242 = vst.msk [vmem:[#allocation3 + $0x28] sm:$0xff] %vm196_vm2, %v224_v42 }
 0x205   :  { %v228_v53 = vpop.permute.xlu1 %227 }
 0x206   :  { %244 = vst.msk [vmem:[#allocation3 + $0x38] sm:$0xff] %vm196_vm2, %v228_v53 }
 0x250   :  { %v573_v54 = vpop.f32.mrb[8].mxu0 }
 0x251   :  { %v1993_v55 = vpop.f32.mrb[9].mxu0  ;;  %v574_v57 = vadd.f32 %v573_v54, %v503_v56 }
 0x253   :  { %v1828_v58 = vmul.f32 -1.442695, %v574_v57 }
 0x255   :  { %2254 = vpow2.f32 %v1828_v58 }
 0x25f   :  { %v2255_v0 = vpop.eup %2254 }
 0x260   :  { %v580_v2 = vadd.f32 1.0, %v2255_v0 }
 0x262   :  { %v654_v60 = vpop.f32.mrb[4].mxu1 }
 0x263   :  { %v655_v61 = vadd.f32 %v654_v60, %v584_v59  ;;  %v2004_v62 = vpop.f32.mrb[5].mxu1 }
 0x265   :  { %v1830_v63 = vmul.f32 -1.442695, %v655_v61 }
 0x267   :  { %2256 = vpow2.f32 %v1830_v63 }
 0x271   :  { %v2257_v1 = vpop.eup %2256 }
 0x272   :  { %v661_v3 = vadd.f32 1.0, %v2257_v1 }
 0x274   :  { %2258 = vrcp.f32 %v661_v3 }
 0x275   :  { %2260 = vrcp.f32 %v580_v2 }
 0x27e   :  { %v2259_v5 = vpop.eup %2258 }
 0x27f   :  { %v664_v8 = vsub.f32 %v2259_v5, %v2639_v19  ;;  %v2261_v9 = vpop.eup %2260 }
 0x281   :  { %v665_v11 = vmul.f32 %v2261_v9, %v664_v8  ;;  %v867_v9 = vld [vmem:[#allocation2 + $0x18] sm:$0xff] }
 0x283   :  { %v666_v17 = vadd.f32 %v665_v11, %v2639_v19 }
 0x285   :  { %668 = vst.msk [vmem:[#allocation4 + $0x8] sm:$0xff] %vm196_vm2, %v666_v17  ;;  %2014 = vmatmul.mubr.msk.f32.vlgmr.msra.gmra.mrb[10].mxu0 %vm196_vm2, %v666_v17  ;;  %v673_v21 = vmul.f32 %v672_v18, %v666_v17 }
 0x286   :  { %2179 = vmatpush3.bf16.msra.mxu0 %v2486_v7  ;;  %2035 = vmatprep.mubr.msk.f32.mxu0 %vm2381_vm1, %v2382_v10 }
 0x287   :  { %v674_v22 = vadd.f32 %v673_v21, %v670_v20  ;;  %2180 = vmatprep.subr.bf16.mxu0 %v2380_v4 }
 0x289   :  { %v675_v23 = vmax.f32 %v674_v22, %v2510_v14 }
 0x28a   :  { %2182 = vmatpush3.bf16.msra.mxu0 %v2505_v13 }
 0x28b   :  { %v676_v19 = vmin.f32 %v675_v23, 1.0  ;;  %2189 = vmatprep.subr.bf16.mxu0 %v2380_v4 }
 0x28d   :  { %v679_v26 = vmul.f32 %v676_v19, %v2662_v32  ;;  %v853_v51 = vsub.f32 1.0, %v676_v19  ;;  %v851_v54 = vmul.f32 %v2502_v12, %v676_v19 }
 0x28f   :  { %v680_v29 = vmul.f32 %v679_v26, %v666_v17  ;;  %v854_v56 = vmul.f32 %v2510_v14, %v853_v51  ;;  %v852_v57 = vadd.f32 %v2515_v15, %v851_v54 }
 0x291   :  { %v681_v30 = vsub.f32 %v678_v27, %v680_v29 }
 0x293   :  { %v682_v33 = vmul.f32 %v681_v30, %v676_v19  ;;  %v859_v62 = vmul.f32 %v2553_v28, %v681_v30 }
 0x295   :  { %v683_v35 = vmul.f32 %v682_v33, %v666_v17  ;;  %v860_v0 = vadd.f32 %v2572_v34, %v859_v62 }
 0x297   :  { %2025 = vmatmul.mubr.msk.f32.vlgmr.msra.gmra.mrb[6].mxu1 %vm196_vm2, %v683_v35 }
 0x298   :  { %2185 = vmatpush3.bf16.msra.mxu1 %v2538_v24  ;;  %2046 = vmatprep.mubr.msk.f32.mxu1 %vm2381_vm1, %v2382_v10 }
 0x299   :  { %2186 = vmatprep.subr.bf16.mxu1 %v2380_v4 }
 0x29c   :  { %2188 = vmatpush3.bf16.msra.mxu1 %v2561_v31 }
 0x29d   :  { %2195 = vmatprep.subr.bf16.mxu1 %v2380_v4 }
 0x358   :  { %v755_v32 = vpop.f32.mrb[10].mxu0 }
 0x359   :  { %v2015_v36 = vpop.f32.mrb[11].mxu0  ;;  %v756_v38 = vadd.f32 %v755_v32, %v685_v37 }
 0x35b   :  { %v1832_v39 = vmul.f32 -1.442695, %v756_v38 }
 0x35d   :  { %2262 = vpow2.f32 %v1832_v39 }
 0x367   :  { %v2263_v46 = vpop.eup %2262 }
 0x368   :  { %v762_v48 = vadd.f32 1.0, %v2263_v46 }
 0x36a   :  { %v836_v41 = vpop.f32.mrb[6].mxu1 }
 0x36b   :  { %v837_v43 = vadd.f32 %v836_v41, %v766_v40  ;;  %v2026_v44 = vpop.f32.mrb[7].mxu1 }
 0x36d   :  { %v1834_v45 = vmul.f32 -1.442695, %v837_v43 }
 0x36f   :  { %2264 = vpow2.f32 %v1834_v45 }
 0x379   :  { %v2265_v47 = vpop.eup %2264 }
 0x37a   :  { %v843_v49 = vadd.f32 1.0, %v2265_v47 }
 0x37c   :  { %2266 = vrcp.f32 %v843_v49 }
 0x37d   :  { %2268 = vrcp.f32 %v762_v48 }
 0x386   :  { %v2267_v50 = vpop.eup %2266 }
 0x387   :  { %v846_v42 = vsub.f32 %v2267_v50, %v666_v17  ;;  %v2269_v52 = vpop.eup %2268 }
 0x389   :  { %v847_v53 = vmul.f32 %v2269_v52, %v846_v42  ;;  %v1049_v52 = vld [vmem:[#allocation2 + $0x20] sm:$0xff] }
 0x38b   :  { %v848_v55 = vadd.f32 %v847_v53, %v666_v17  ;;  %v948_v17 = vld [vmem:[#allocation3 + $0x18] sm:$0xff] }
 0x38d   :  { %850 = vst.msk [vmem:[#allocation4 + $0x10] sm:$0xff] %vm196_vm2, %v848_v55  ;;  %2036 = vmatmul.mubr.msk.f32.vlgmr.msra.gmra.mrb[12].mxu0 %vm196_vm2, %v848_v55  ;;  %v855_v58 = vmul.f32 %v854_v56, %v848_v55 }
 0x38e   :  { %2191 = vmatpush3.bf16.msra.mxu0 %v2486_v7  ;;  %2057 = vmatprep.mubr.msk.f32.mxu0 %vm2381_vm1, %v2382_v10 }
 0x38f   :  { %v856_v59 = vadd.f32 %v855_v58, %v852_v57  ;;  %2192 = vmatprep.subr.bf16.mxu0 %v2380_v4 }
 0x391   :  { %v857_v60 = vmax.f32 %v856_v59, %v2510_v14 }
 0x392   :  { %2194 = vmatpush3.bf16.msra.mxu0 %v2505_v13 }
 0x393   :  { %v858_v61 = vmin.f32 %v857_v60, 1.0  ;;  %2201 = vmatprep.subr.bf16.mxu0 %v2380_v4 }
 0x395   :  { %v861_v63 = vmul.f32 %v858_v61, %v681_v30  ;;  %v1035_v29 = vsub.f32 1.0, %v858_v61  ;;  %v1033_v32 = vmul.f32 %v2502_v12, %v858_v61 }
 0x397   :  { %v862_v1 = vmul.f32 %v861_v63, %v848_v55  ;;  %v1036_v37 = vmul.f32 %v2510_v14, %v1035_v29  ;;  %v1034_v38 = vadd.f32 %v2515_v15, %v1033_v32 }
 0x399   :  { %v863_v2 = vsub.f32 %v860_v0, %v862_v1 }
 0x39b   :  { %v864_v3 = vmul.f32 %v863_v2, %v858_v61  ;;  %v1041_v44 = vmul.f32 %v2553_v28, %v863_v2 }
 0x39d   :  { %v865_v5 = vmul.f32 %v864_v3, %v848_v55  ;;  %v1042_v46 = vadd.f32 %v2572_v34, %v1041_v44 }
 0x39f   :  { %2047 = vmatmul.mubr.msk.f32.vlgmr.msra.gmra.mrb[8].mxu1 %vm196_vm2, %v865_v5 }
 0x3a0   :  { %2197 = vmatpush3.bf16.msra.mxu1 %v2538_v24  ;;  %2068 = vmatprep.mubr.msk.f32.mxu1 %vm2381_vm1, %v2382_v10 }
 0x3a1   :  { %2198 = vmatprep.subr.bf16.mxu1 %v2380_v4 }
 0x3a4   :  { %2200 = vmatpush3.bf16.msra.mxu1 %v2561_v31 }
 0x3a5   :  { %2207 = vmatprep.subr.bf16.mxu1 %v2380_v4 }
 0x460   :  { %v937_v6 = vpop.f32.mrb[12].mxu0 }
 0x461   :  { %v2037_v8 = vpop.f32.mrb[13].mxu0  ;;  %v938_v11 = vadd.f32 %v937_v6, %v867_v9 }
 0x463   :  { %v1836_v16 = vmul.f32 -1.442695, %v938_v11 }
 0x465   :  { %2270 = vpow2.f32 %v1836_v16 }
 0x46f   :  { %v2271_v23 = vpop.eup %2270 }
 0x470   :  { %v944_v25 = vadd.f32 1.0, %v2271_v23 }
 0x472   :  { %v1018_v18 = vpop.f32.mrb[8].mxu1 }
 0x473   :  { %v1019_v20 = vadd.f32 %v1018_v18, %v948_v17  ;;  %v2048_v21 = vpop.f32.mrb[9].mxu1 }
 0x475   :  { %v1838_v22 = vmul.f32 -1.442695, %v1019_v20 }
 0x477   :  { %2272 = vpow2.f32 %v1838_v22 }
 0x481   :  { %v2273_v19 = vpop.eup %2272 }
 0x482   :  { %v1025_v26 = vadd.f32 1.0, %v2273_v19 }
 0x484   :  { %2274 = vrcp.f32 %v1025_v26 }
 0x485   :  { %2276 = vrcp.f32 %v944_v25 }
 0x48e   :  { %v2275_v27 = vpop.eup %2274 }
 0x48f   :  { %v1028_v30 = vsub.f32 %v2275_v27, %v848_v55  ;;  %v2277_v33 = vpop.eup %2276 }
 0x491   :  { %v1029_v35 = vmul.f32 %v2277_v33, %v1028_v30  ;;  %v1231_v33 = vld [vmem:[#allocation2 + $0x28] sm:$0xff] }
 0x493   :  { %v1030_v36 = vadd.f32 %v1029_v35, %v848_v55  ;;  %v1130_v55 = vld [vmem:[#allocation3 + $0x20] sm:$0xff] }
 0x495   :  { %1032 = vst.msk [vmem:[#allocation4 + $0x18] sm:$0xff] %vm196_vm2, %v1030_v36  ;;  %2058 = vmatmul.mubr.msk.f32.vlgmr.msra.gmra.mrb[14].mxu0 %vm196_vm2, %v1030_v36  ;;  %v1037_v39 = vmul.f32 %v1036_v37, %v1030_v36 }
 0x496   :  { %2203 = vmatpush3.bf16.msra.mxu0 %v2486_v7  ;;  %2079 = vmatprep.mubr.msk.f32.mxu0 %vm2381_vm1, %v2382_v10 }
 0x497   :  { %v1038_v40 = vadd.f32 %v1037_v39, %v1034_v38  ;;  %2204 = vmatprep.subr.bf16.mxu0 %v2380_v4 }
 0x499   :  { %v1039_v41 = vmax.f32 %v1038_v40, %v2510_v14 }
 0x49a   :  { %2206 = vmatpush3.bf16.msra.mxu0 %v2505_v13 }
 0x49b   :  { %v1040_v43 = vmin.f32 %v1039_v41, 1.0  ;;  %2213 = vmatprep.subr.bf16.mxu0 %v2380_v4 }
 0x49d   :  { %v1043_v45 = vmul.f32 %v1040_v43, %v863_v2  ;;  %v1217_v1 = vsub.f32 1.0, %v1040_v43  ;;  %v1215_v6 = vmul.f32 %v2502_v12, %v1040_v43 }
 0x49f   :  { %v1044_v47 = vmul.f32 %v1043_v45, %v1030_v36  ;;  %v1218_v9 = vmul.f32 %v2510_v14, %v1217_v1  ;;  %v1216_v11 = vadd.f32 %v2515_v15, %v1215_v6  ;;  %v1413_v1 = vld [vmem:[#allocation2 + $0x30] sm:$0xff] }
 0x4a1   :  { %v1045_v48 = vsub.f32 %v1042_v46, %v1044_v47 }
 0x4a3   :  { %v1046_v49 = vmul.f32 %v1045_v48, %v1040_v43  ;;  %v1223_v21 = vmul.f32 %v2553_v28, %v1045_v48 }
 0x4a5   :  { %v1047_v50 = vmul.f32 %v1046_v49, %v1030_v36  ;;  %v1224_v23 = vadd.f32 %v2572_v34, %v1223_v21 }
 0x4a7   :  { %2069 = vmatmul.mubr.msk.f32.vlgmr.msra.gmra.mrb[10].mxu1 %vm196_vm2, %v1047_v50 }
 0x4a8   :  { %2209 = vmatpush3.bf16.msra.mxu1 %v2538_v24  ;;  %2090 = vmatprep.mubr.msk.f32.mxu1 %vm2381_vm1, %v2382_v10 }
 0x4a9   :  { %2210 = vmatprep.subr.bf16.mxu1 %v2380_v4 }
 0x4ac   :  { %2212 = vmatpush3.bf16.msra.mxu1 %v2561_v31 }
 0x4ad   :  { %2219 = vmatprep.subr.bf16.mxu1 %v2380_v4 }
 0x568   :  { %v1119_v51 = vpop.f32.mrb[14].mxu0 }
 0x569   :  { %v2059_v42 = vpop.f32.mrb[15].mxu0  ;;  %v1120_v53 = vadd.f32 %v1119_v51, %v1049_v52 }
 0x56b   :  { %v1840_v54 = vmul.f32 -1.442695, %v1120_v53 }
 0x56d   :  { %2278 = vpow2.f32 %v1840_v54 }
 0x577   :  { %v2279_v60 = vpop.eup %2278 }
 0x578   :  { %v1126_v62 = vadd.f32 1.0, %v2279_v60 }
 0x57a   :  { %v1200_v56 = vpop.f32.mrb[10].mxu1 }
 0x57b   :  { %v1201_v57 = vadd.f32 %v1200_v56, %v1130_v55  ;;  %v2070_v58 = vpop.f32.mrb[11].mxu1 }
 0x57d   :  { %v1842_v59 = vmul.f32 -1.442695, %v1201_v57 }
 0x57f   :  { %2280 = vpow2.f32 %v1842_v59 }
 0x589   :  { %v2281_v61 = vpop.eup %2280 }
 0x58a   :  { %v1207_v63 = vadd.f32 1.0, %v2281_v61 }
 0x58c   :  { %2282 = vrcp.f32 %v1207_v63 }
 0x58d   :  { %2284 = vrcp.f32 %v1126_v62 }
 0x596   :  { %v2283_v0 = vpop.eup %2282 }
 0x597   :  { %v1210_v2 = vsub.f32 %v2283_v0, %v1030_v36  ;;  %v2285_v3 = vpop.eup %2284 }
 0x599   :  { %v1211_v5 = vmul.f32 %v2285_v3, %v1210_v2 }
 0x59b   :  { %v1212_v8 = vadd.f32 %v1211_v5, %v1030_v36  ;;  %v1312_v36 = vld [vmem:[#allocation3 + $0x28] sm:$0xff]  ;;  %v1494_v5 = vld [vmem:[#allocation3 + $0x30] sm:$0xff] }
 0x59d   :  { %1214 = vst.msk [vmem:[#allocation4 + $0x20] sm:$0xff] %vm196_vm2, %v1212_v8  ;;  %2080 = vmatmul.mubr.msk.f32.vlgmr.msra.gmra.mrb[16].mxu0 %vm196_vm2, %v1212_v8  ;;  %v1219_v16 = vmul.f32 %v1218_v9, %v1212_v8 }
 0x59e   :  { %2215 = vmatpush3.bf16.msra.mxu0 %v2486_v7  ;;  %2101 = vmatprep.mubr.msk.f32.mxu0 %vm2381_vm1, %v2382_v10 }
 0x59f   :  { %v1220_v17 = vadd.f32 %v1219_v16, %v1216_v11  ;;  %2216 = vmatprep.subr.bf16.mxu0 %v2380_v4 }
 0x5a1   :  { %v1221_v18 = vmax.f32 %v1220_v17, %v2510_v14 }
 0x5a2   :  { %2218 = vmatpush3.bf16.msra.mxu0 %v2505_v13 }
 0x5a3   :  { %v1222_v20 = vmin.f32 %v1221_v18, 1.0  ;;  %2225 = vmatprep.subr.bf16.mxu0 %v2380_v4 }
 0x5a5   :  { %v1225_v22 = vmul.f32 %v1222_v20, %v1045_v48  ;;  %v1399_v47 = vsub.f32 1.0, %v1222_v20  ;;  %v1397_v51 = vmul.f32 %v2502_v12, %v1222_v20 }
 0x5a7   :  { %v1226_v19 = vmul.f32 %v1225_v22, %v1212_v8  ;;  %v1400_v52 = vmul.f32 %v2510_v14, %v1399_v47  ;;  %v1398_v53 = vadd.f32 %v2515_v15, %v1397_v51 }
 0x5a9   :  { %v1227_v25 = vsub.f32 %v1224_v23, %v1226_v19 }
 0x5ab   :  { %v1228_v26 = vmul.f32 %v1227_v25, %v1222_v20  ;;  %v1405_v58 = vmul.f32 %v2553_v28, %v1227_v25 }
 0x5ad   :  { %v1229_v27 = vmul.f32 %v1228_v26, %v1212_v8  ;;  %v1406_v60 = vadd.f32 %v2572_v34, %v1405_v58 }
 0x5af   :  { %2091 = vmatmul.mubr.msk.f32.vlgmr.msra.gmra.mrb[12].mxu1 %vm196_vm2, %v1229_v27 }
 0x5b0   :  { %2221 = vmatpush3.bf16.msra.mxu1 %v2538_v24  ;;  %2112 = vmatprep.mubr.msk.f32.mxu1 %vm2381_vm1, %v2382_v10 }
 0x5b1   :  { %2222 = vmatprep.subr.bf16.mxu1 %v2380_v4 }
 0x5b4   :  { %2224 = vmatpush3.bf16.msra.mxu1 %v2561_v31 }
 0x5b5   :  { %2231 = vmatprep.subr.bf16.mxu1 %v2380_v4 }
 0x670   :  { %v1301_v29 = vpop.f32.mrb[16].mxu0 }
 0x671   :  { %v2081_v30 = vpop.f32.mrb[17].mxu0  ;;  %v1302_v35 = vadd.f32 %v1301_v29, %v1231_v33 }
 0x673   :  { %v1844_v32 = vmul.f32 -1.442695, %v1302_v35 }
 0x675   :  { %2286 = vpow2.f32 %v1844_v32 }
 0x67f   :  { %v2287_v41 = vpop.eup %2286 }
 0x680   :  { %v1308_v44 = vadd.f32 1.0, %v2287_v41 }
 0x682   :  { %v1382_v37 = vpop.f32.mrb[12].mxu1 }
 0x683   :  { %v1383_v38 = vadd.f32 %v1382_v37, %v1312_v36  ;;  %v2092_v39 = vpop.f32.mrb[13].mxu1 }
 0x685   :  { %v1846_v40 = vmul.f32 -1.442695, %v1383_v38 }
 0x687   :  { %2288 = vpow2.f32 %v1846_v40 }
 0x691   :  { %v2289_v43 = vpop.eup %2288 }
 0x692   :  { %v1389_v45 = vadd.f32 1.0, %v2289_v43 }
 0x694   :  { %2290 = vrcp.f32 %v1389_v45 }
 0x695   :  { %2292 = vrcp.f32 %v1308_v44 }
 0x69e   :  { %v2291_v46 = vpop.eup %2290 }
 0x69f   :  { %v1392_v48 = vsub.f32 %v2291_v46, %v1212_v8  ;;  %v2293_v49 = vpop.eup %2292 }
 0x6a1   :  { %v1393_v50 = vmul.f32 %v2293_v49, %v1392_v48 }
 0x6a3   :  { %v1394_v42 = vadd.f32 %v1393_v50, %v1212_v8 }
 0x6a5   :  { %1396 = vst.msk [vmem:[#allocation4 + $0x28] sm:$0xff] %vm196_vm2, %v1394_v42  ;;  %2102 = vmatmul.mubr.msk.f32.vlgmr.msra.gmra.mrb[18].mxu0 %vm196_vm2, %v1394_v42  ;;  %v1401_v54 = vmul.f32 %v1400_v52, %v1394_v42 }
 0x6a6   :  { %2227 = vmatpush3.bf16.msra.mxu0 %v2486_v7  ;;  %2123 = vmatprep.mubr.msk.f32.mxu0 %vm2381_vm1, %v2382_v10 }
 0x6a7   :  { %v1402_v55 = vadd.f32 %v1401_v54, %v1398_v53  ;;  %2228 = vmatprep.subr.bf16.mxu0 %v2380_v4 }
 0x6a9   :  { %v1403_v56 = vmax.f32 %v1402_v55, %v2510_v14 }
 0x6aa   :  { %2230 = vmatpush3.bf16.msra.mxu0 %v2505_v13 }
 0x6ab   :  { %v1404_v57 = vmin.f32 %v1403_v56, 1.0 }
 0x6ad   :  { %v1407_v59 = vmul.f32 %v1404_v57, %v1227_v25  ;;  %v1581_v18 = vsub.f32 1.0, %v1404_v57  ;;  %v1579_v22 = vmul.f32 %v2502_v12, %v1404_v57 }
 0x6af   :  { %v1408_v61 = vmul.f32 %v1407_v59, %v1394_v42  ;;  %v1582_v19 = vmul.f32 %v2510_v14, %v1581_v18  ;;  %v1580_v25 = vadd.f32 %v2515_v15, %v1579_v22 }
 0x6b1   :  { %v1409_v62 = vsub.f32 %v1406_v60, %v1408_v61 }
 0x6b3   :  { %v1410_v63 = vmul.f32 %v1409_v62, %v1404_v57  ;;  %v1587_v12 = vmul.f32 %v2553_v28, %v1409_v62 }
 0x6b5   :  { %v1411_v7 = vmul.f32 %v1410_v63, %v1394_v42  ;;  %v1588_v35 = vadd.f32 %v2572_v34, %v1587_v12 }
 0x6b7   :  { %2113 = vmatmul.mubr.msk.f32.vlgmr.msra.gmra.mrb[14].mxu1 %vm196_vm2, %v1411_v7 }
 0x6b8   :  { %2233 = vmatpush3.bf16.msra.mxu1 %v2538_v24  ;;  %2134 = vmatprep.mubr.msk.f32.mxu1 %vm2381_vm1, %v2382_v10 }
 0x6b9   :  { %2234 = vmatprep.subr.bf16.mxu1 %v2380_v4 }
 0x6bc   :  { %2236 = vmatpush3.bf16.msra.mxu1 %v2561_v31 }
 0x778   :  { %v1483_v13 = vpop.f32.mrb[18].mxu0 }
 0x779   :  { %v2103_v0 = vpop.f32.mrb[19].mxu0  ;;  %v1484_v2 = vadd.f32 %v1483_v13, %v1413_v1 }
 0x77b   :  { %v1848_v3 = vmul.f32 -1.442695, %v1484_v2 }
 0x77d   :  { %2294 = vpow2.f32 %v1848_v3 }
 0x787   :  { %v2295_v24 = vpop.eup %2294 }
 0x788   :  { %v1490_v17 = vadd.f32 1.0, %v2295_v24 }
 0x78a   :  { %v1564_v6 = vpop.f32.mrb[14].mxu1 }
 0x78b   :  { %v1565_v8 = vadd.f32 %v1564_v6, %v1494_v5  ;;  %v2114_v9 = vpop.f32.mrb[15].mxu1 }
 0x78d   :  { %v1850_v11 = vmul.f32 -1.442695, %v1565_v8 }
 0x78f   :  { %2296 = vpow2.f32 %v1850_v11 }
 0x799   :  { %v2297_v16 = vpop.eup %2296 }
 0x79a   :  { %v1571_v10 = vadd.f32 1.0, %v2297_v16 }
 0x79c   :  { %2298 = vrcp.f32 %v1571_v10 }
 0x79d   :  { %2300 = vrcp.f32 %v1490_v17 }
 0x7a6   :  { %v2299_v4 = vpop.eup %2298 }
 0x7a7   :  { %v1574_v31 = vsub.f32 %v2299_v4, %v1394_v42  ;;  %v2301_v20 = vpop.eup %2300 }
 0x7a9   :  { %v1575_v21 = vmul.f32 %v2301_v20, %v1574_v31 }
 0x7ab   :  { %v2808_v23 = vadd.f32 %v1575_v21, %v1394_v42 }
 0x7ad   :  { %1578 = vst.msk [vmem:[#allocation4 + $0x30] sm:$0xff] %vm196_vm2, %v2808_v23  ;;  %2124 = vmatmul.mubr.msk.f32.vlgmr.msra.gmra.mrb[20].mxu0 %vm196_vm2, %v2808_v23  ;;  %v1583_v26 = vmul.f32 %v1582_v19, %v2808_v23 }
 0x7af   :  { %v1584_v27 = vadd.f32 %v1583_v26, %v1580_v25 }
 0x7b1   :  { %v1585_v29 = vmax.f32 %v1584_v27, %v2510_v14 }
 0x7b3   :  { %v1586_v30 = vmin.f32 %v1585_v29, 1.0 }
 0x7b5   :  { %v1589_v33 = vmul.f32 %v1586_v30, %v1409_v62  ;;  %1761 = vst.msk [vmem:[#allocation6] sm:$0xff] %vm196_vm2, %v1586_v30 }
 0x7b7   :  { %v1590_v32 = vmul.f32 %v1589_v33, %v2808_v23 }
 0x7b9   :  { %v1591_v36 = vsub.f32 %v1588_v35, %v1590_v32 }
 0x7bb   :  { %v1592_v37 = vmul.f32 %v1591_v36, %v1586_v30  ;;  %1762 = vst.msk [vmem:[#allocation8] sm:$0xff] %vm196_vm2, %v1591_v36 }
 0x7bd   :  { %v1593_v15 = vmul.f32 %v1592_v37, %v2808_v23 }
 0x7bf   :  { %2135 = vmatmul.mubr.msk.f32.vlgmr.msra.gmra.mrb[16].mxu1 %vm196_vm2, %v1593_v15 }
 0x7c0   :  { %2321 = shalt.err (!%p2318_p4)
}
 0x7c1   :  { %s2322_s28 = scalar_lea.hbm %s2878_s14, 128 }
 0x7c2   :  { %p2323_p5 = scmp.ne.s32.totalorder %s2878_s14, %s2322_s28  ;;  %p2326_p6 = scmp.lt.u32.totalorder %s2322_s28, %s2878_s14 }
 0x7c4   :  { %p2328_p7 = pnand %p2326_p6, %p2323_p5 }
 0x7c6   :  { %2331 = shalt.err (!%p2328_p7)
}
 0x7c7   :  { %1784 = dma.vmem_to_hbm [thread:$0]  %s1782_s2, 128, %s2878_s14, [#allocation7]  }
 0x7c8   :  { %s2385_s8 = smov [#allocation8]  }
 0x7c9   :  { %s1791_s7 = sshll.u32 %s2385_s8, 4  ;;  %s1792_s7 = int_to_ptr.vmem [resolvable:$true] %s1791_s7 }
 0x7ca   :  { %s2332_s11 = scalar_lea.vmem %s1792_s7, 128  ;;  %p2337_p9 = scmp.lt.s32.totalorder %s1792_s7, %s1792_s7 }
 0x7cb   :  { %p2333_p8 = scmp.ne.s32.totalorder %s1792_s7, %s2332_s11  ;;  %p2338_p10 = scmp.lt.s32.totalorder %s2332_s11, %s2332_s11 }
 0x7cd   :  { %p2339_p11 = por %p2338_p10, %p2337_p9 }
 0x7cf   :  { %p2340_p12 = pnand %p2339_p11, %p2333_p8 }
 0x7d1   :  { %2343 = shalt.err (!%p2340_p12)
}
 0x7d2   :  { %s2344_s12 = scalar_lea.hbm %s2879_s15, 128 }
 0x7d3   :  { %p2345_p13 = scmp.ne.s32.totalorder %s2879_s15, %s2344_s12  ;;  %p2348_p0 = scmp.lt.u32.totalorder %s2344_s12, %s2879_s15 }
 0x7d5   :  { %p2350_p1 = pnand %p2348_p0, %p2345_p13 }
 0x7d7   :  { %2353 = shalt.err (!%p2350_p1)
}
 0x7d8   :  { %1794 = dma.vmem_to_hbm [thread:$0]  %s1792_s7, 128, %s2879_s15, [#allocation7]   ;;  %v1595_v34 = vld [vmem:[#allocation2 + $0x38] sm:$0xff] }
 0x7d9   :  { %v1676_v40 = vld [vmem:[#allocation3 + $0x38] sm:$0xff]  ;;  %s2386_s15 = smov [#allocation4]  }
 0x7da   :  { %s1768_s24 = sshll.u32 %s2386_s15, 4  ;;  %s1769_s24 = int_to_ptr.vmem [resolvable:$true] %s1768_s24 }
 0x7db   :  { %s2354_s6 = scalar_lea.vmem %s1769_s24, 1024  ;;  %p2359_p3 = scmp.lt.s32.totalorder %s1769_s24, %s1769_s24 }
 0x7dc   :  { %p2355_p2 = scmp.ne.s32.totalorder %s1769_s24, %s2354_s6  ;;  %p2360_p4 = scmp.lt.s32.totalorder %s2354_s6, %s2354_s6 }
 0x7de   :  { %p2361_p5 = por %p2360_p4, %p2359_p3 }
 0x7e0   :  { %p2362_p6 = pnand %p2361_p5, %p2355_p2 }
 0x880   :  { %v1665_v14 = vpop.f32.mrb[20].mxu0 }
 0x881   :  { %v2125_v28 = vpop.f32.mrb[21].mxu0  ;;  %v1666_v38 = vadd.f32 %v1665_v14, %v1595_v34 }
 0x883   :  { %v1852_v39 = vmul.f32 -1.442695, %v1666_v38 }
 0x885   :  { %2302 = vpow2.f32 %v1852_v39 }
 0x88f   :  { %v2303_v46 = vpop.eup %2302 }
 0x890   :  { %v1672_v48 = vadd.f32 1.0, %v2303_v46 }
 0x892   :  { %v1746_v41 = vpop.f32.mrb[16].mxu1 }
 0x893   :  { %v1747_v43 = vadd.f32 %v1746_v41, %v1676_v40  ;;  %v2136_v44 = vpop.f32.mrb[17].mxu1 }
 0x895   :  { %v1854_v45 = vmul.f32 -1.442695, %v1747_v43 }
 0x897   :  { %2304 = vpow2.f32 %v1854_v45 }
 0x8a1   :  { %v2305_v47 = vpop.eup %2304 }
 0x8a2   :  { %v1753_v49 = vadd.f32 1.0, %v2305_v47 }
 0x8a4   :  { %2306 = vrcp.f32 %v1753_v49 }
 0x8a5   :  { %2308 = vrcp.f32 %v1672_v48 }
 0x8ae   :  { %v2307_v50 = vpop.eup %2306 }
 0x8af   :  { %v1756_v51 = vsub.f32 %v2307_v50, %v2808_v23  ;;  %v2309_v42 = vpop.eup %2308 }
 0x8b1   :  { %v1757_v52 = vmul.f32 %v2309_v42, %v1756_v51 }
 0x8b3   :  { %v1758_v53 = vadd.f32 %v1757_v52, %v2808_v23 }
 0x8b5   :  { %1760 = vst.msk [vmem:[#allocation4 + $0x38] sm:$0xff] %vm196_vm2, %v1758_v53 }
 0x8b6   :  { %2365 = shalt.err (!%p2362_p6)
}
 0x8b7   :  { %s2366_s26 = scalar_lea.hbm %s2877_s13, 1024 }
 0x8b8   :  { %p2367_p7 = scmp.ne.s32.totalorder %s2877_s13, %s2366_s26  ;;  %p2370_p8 = scmp.lt.u32.totalorder %s2366_s26, %s2877_s13 }
 0x8ba   :  { %p2372_p9 = pnand %p2370_p8, %p2367_p7 }
 0x8bc   :  { %2375 = shalt.err (!%p2372_p9)
}
 0x8bd   :  { %s2387_s9 = smov 128   ;;  %s2388_s28 = smov 8  }
 0x8be   :  { %1774 = dma.vmem_to_hbm [thread:$0]  %s1769_s24, 1024, %s2877_s13, [#allocation5], %s2387_s9, %s2387_s9, %s2388_s28  }
 0x8bf   :  { %2376 = dma.done.wait [#allocation5], 1024  }
 0x8c0   :  { %2377 = vsyncadd [#allocation5], 4294966272 }
 0x8c1   :  { %2378 = dma.done.wait [#allocation7], 256  }
 0x8c2   :  { %2379 = vsyncadd [#allocation7], 4294967040 }
 0x8c3   :  { %1804 = vsyncpa [#allocation5], 1 }
 0x8c4   :  { %1805 = vsyncpa [#allocation7], 1 }

</bundles_post_ra>
